<compile_context>
chip_gen: v6e
topology: v6e:2x2x1
jax: 0.10.0
libtpu: 0.0.40
codegen_flags: <defaults>
</compile_context>

<pallas_src>
import functools

import jax
import jax.numpy as jnp
from jax import lax
from jax.experimental import pallas as pl
from jax.experimental.pallas import tpu as pltpu


def _lstm_kernel(x_ref, w_ih_ref, w_hh_hbm_ref, b_ref, w_lin_ref, b_lin_ref,
                 pred_ref, w_hh_vmem, dma_sem, *, seq_len, input_size, hp):
    """Runs the full LSTM recurrence and the fused output Linear.

    x_ref:        (T, input_size)    f32   VMEM
    w_ih_ref:     (input_size, 4*hp) f32   VMEM  gate-major [i|f|g|o], g cols x2
    w_hh_hbm_ref: (hp, 4*hp)         bf16  HBM (pl.ANY) -> manual DMA
    b_ref:        (1, 4*hp)          f32   VMEM  b_ih + b_hh (g slice x2)
    w_lin_ref:    (O, hp)            f32   VMEM  padded lanes zero
    b_lin_ref:    (O, 1)             f32   VMEM
    pred_ref:     (O, 1)             f32   output
    w_hh_vmem:    (hp, 4*hp)         bf16  VMEM scratch (DMA destination)
    dma_sem:      DMA semaphore
    """
    # Kick off the W_hh HBM->VMEM copy; overlap it with the input projection.
    w_cp = pltpu.make_async_copy(w_hh_hbm_ref, w_hh_vmem, dma_sem)
    w_cp.start()

    # Hoisted input projection + bias for the whole sequence, kept as a value.
    if input_size == 1:
        # K=1 matmul is just a broadcast multiply -> VPU, no MXU fill/drain.
        gx = x_ref[...] * w_ih_ref[...] + b_ref[...]          # (T, 4*hp) f32
    else:
        gx = jnp.dot(x_ref[...], w_ih_ref[...],
                     preferred_element_type=jnp.float32) + b_ref[...]

    w_cp.wait()

    h = jnp.zeros((1, hp), jnp.float32)
    c = jnp.zeros((1, hp), jnp.float32)
    # seq_len is static -> fully unrolled; gx rows are static slices (no
    # per-step VMEM load on the serial dependency chain).
    for t in range(seq_len):
        z = gx[t:t + 1, :] + jnp.dot(
            h.astype(w_hh_vmem.dtype), w_hh_vmem[...],
            preferred_element_type=jnp.float32)                # (1, 4*hp)
        # One wide sigmoid over all four gates; g recovered via
        # tanh(z) = 2*sigmoid(2z) - 1 (its weights/bias were pre-scaled by 2).
        s = jax.nn.sigmoid(z)
        i = s[:, 0 * hp:1 * hp]
        f = s[:, 1 * hp:2 * hp]
        g = 2.0 * s[:, 2 * hp:3 * hp] - 1.0
        o = s[:, 3 * hp:4 * hp]
        c = f * c + i * g
        h = o * jnp.tanh(c)

    # Fused final Linear: VPU multiply + XLU lane reduction + bias.
    pred_ref[...] = (jnp.sum(h * w_lin_ref[...], axis=-1, keepdims=True)
                     + b_lin_ref[...])


def pack_lstm_params(params, input_size, hidden_size):
    """One-time repack of PyTorch-layout weights into a padded, matmul-friendly
    layout. Call once; do NOT call per-inference."""
    w_ih, w_hh, b_ih, b_hh, w_lin, b_lin = params
    H = hidden_size
    Hp = ((H + 127) // 128) * 128
    pad = Hp - H
    # Pre-scale the g-gate (index 2) by 2 so the kernel can fuse all four gate
    # activations into a single sigmoid (tanh(z) = 2*sigmoid(2z) - 1).
    # Padded lanes keep pre-activation exactly 0 -> g = 0 there, so the padded
    # hidden state stays 0 and cannot leak into the output.
    gscale = jnp.array([1.0, 1.0, 2.0, 1.0], jnp.float32)[None, :, None]

    # (4H, in) -> (in, 4, Hp) -> (in, 4*Hp); stays f32 (tiny, VPU path).
    w_ih_k = jnp.pad(
        w_ih.astype(jnp.float32).reshape(4, H, input_size).transpose(2, 0, 1),
        ((0, 0), (0, 0), (0, pad)))
    w_ih_k = (w_ih_k * gscale).reshape(input_size, 4 * Hp)

    # (4H, H) -> (Hp, 4, Hp) -> (Hp, 4*Hp); bf16 for MXU + halved DMA/vld.
    w_hh_k = jnp.pad(
        w_hh.astype(jnp.float32).reshape(4, H, H).transpose(2, 0, 1),
        ((0, pad), (0, 0), (0, pad)))
    w_hh_k = (w_hh_k * gscale).reshape(Hp, 4 * Hp).astype(jnp.bfloat16)

    b_k = jnp.pad((b_ih + b_hh).astype(jnp.float32).reshape(4, H),
                  ((0, 0), (0, pad)))
    b_k = (b_k * gscale[0]).reshape(1, 4 * Hp)

    # Final linear, pre-padded so it can be fused into the kernel epilogue.
    w_lin_k = jnp.pad(w_lin.astype(jnp.float32), ((0, 0), (0, pad)))  # (O, Hp)
    b_lin_k = b_lin.astype(jnp.float32).reshape(-1, 1)                # (O, 1)

    return {
        "w_ih": w_ih_k,
        "w_hh": w_hh_k,
        "b": b_k,
        "w_lin": w_lin_k,
        "b_lin": b_lin_k,
    }


@jax.jit
def lstm_forward_pallas(input_seq, packed):
    """Matches LSTM.forward(input_seq): returns shape (output_size,)."""
    seq_len = input_seq.shape[0]
    x = input_seq.reshape(seq_len, -1).astype(jnp.float32)     # (T, input_size)
    input_size = x.shape[1]
    Hp = packed["w_hh"].shape[0]
    out_size = packed["w_lin"].shape[0]

    kernel = functools.partial(_lstm_kernel, seq_len=seq_len,
                               input_size=input_size, hp=Hp)
    pred = pl.pallas_call(
        kernel,
        out_shape=jax.ShapeDtypeStruct((out_size, 1), jnp.float32),
        in_specs=[
            pl.BlockSpec(memory_space=pltpu.MemorySpace.VMEM),   # x
            pl.BlockSpec(memory_space=pltpu.MemorySpace.VMEM),   # w_ih
            pl.BlockSpec(memory_space=pl.ANY),                   # w_hh (HBM)
            pl.BlockSpec(memory_space=pltpu.MemorySpace.VMEM),   # b
            pl.BlockSpec(memory_space=pltpu.MemorySpace.VMEM),   # w_lin
            pl.BlockSpec(memory_space=pltpu.MemorySpace.VMEM),   # b_lin
        ],
        out_specs=pl.BlockSpec(memory_space=pltpu.MemorySpace.VMEM),
        scratch_shapes=[
            pltpu.VMEM((Hp, 4 * Hp), packed["w_hh"].dtype),      # W_hh landing
            pltpu.SemaphoreType.DMA(()),
        ],
    )(x, packed["w_ih"], packed["w_hh"], packed["b"],
      packed["w_lin"], packed["b_lin"])

    return pred[:, 0]                                            # (output_size,)


def lstm_forward_ref(input_seq, params, hidden_size, output_size):
    """Pure-JAX reference mirroring PyTorch nn.LSTM + nn.Linear semantics."""
    w_ih, w_hh, b_ih, b_hh, w_lin, b_lin = params
    T = input_seq.shape[0]
    x = input_seq.reshape(T, -1).astype(jnp.float32)
    H = hidden_size
    h = jnp.zeros((1, H), jnp.float32)
    c = jnp.zeros((1, H), jnp.float32)
    outs = []
    for t in range(T):
        gates = x[t:t + 1] @ w_ih.T + b_ih + h @ w_hh.T + b_hh
        i = jax.nn.sigmoid(gates[:, 0 * H:1 * H])
        f = jax.nn.sigmoid(gates[:, 1 * H:2 * H])
        g = jnp.tanh(gates[:, 2 * H:3 * H])
        o = jax.nn.sigmoid(gates[:, 3 * H:4 * H])
        c = f * c + i * g
        h = o * jnp.tanh(c)
        outs.append(h)
    preds = jnp.concatenate(outs, axis=0) @ w_lin.T + b_lin
    return preds[-1]


def init_params(key, input_size, hidden_size, output_size):
    """Deterministic init matching PyTorch shapes (U(-k, k), k = 1/sqrt(H))."""
    k = 1.0 / jnp.sqrt(jnp.float32(hidden_size))
    ks = jax.random.split(key, 6)
    w_ih = jax.random.uniform(ks[0], (4 * hidden_size, input_size), jnp.float32, -k, k)
    w_hh = jax.random.uniform(ks[1], (4 * hidden_size, hidden_size), jnp.float32, -k, k)
    b_ih = jax.random.uniform(ks[2], (4 * hidden_size,), jnp.float32, -k, k)
    b_hh = jax.random.uniform(ks[3], (4 * hidden_size,), jnp.float32, -k, k)
    w_lin = jax.random.uniform(ks[4], (output_size, hidden_size), jnp.float32, -k, k)
    b_lin = jax.random.uniform(ks[5], (output_size,), jnp.float32, -k, k)
    return (w_ih, w_hh, b_ih, b_hh, w_lin, b_lin)


if __name__ == "__main__":
    INPUT_SIZE = 1
    HIDDEN_SIZE = 100
    OUTPUT_SIZE = 1
    SEQ_LEN = 8

    key = jax.random.PRNGKey(0)
    k_params, k_x = jax.random.split(key)
    params = init_params(k_params, INPUT_SIZE, HIDDEN_SIZE, OUTPUT_SIZE)
    # input_seq: 1-D sequence of length SEQ_LEN (as the PyTorch module expects)
    input_seq = jax.random.normal(k_x, (SEQ_LEN,), jnp.float32)

    # One-time weight repack (hoisted out of the inference path).
    packed = jax.tree_util.tree_map(
        jax.block_until_ready, pack_lstm_params(params, INPUT_SIZE, HIDDEN_SIZE))

    pred = lstm_forward_pallas(input_seq, packed)
    pred = jax.block_until_ready(pred)

    ref = lstm_forward_ref(input_seq, params, HIDDEN_SIZE, OUTPUT_SIZE)
    assert pred.shape == (OUTPUT_SIZE,)
    assert jnp.allclose(pred, ref, atol=5e-3, rtol=5e-3), (pred, ref)

    print("KERNEL_OK")
</pallas_src>

<mosaic_0001>
module attributes {stable_mosaic.version = 11 : i64} {
  func.func @_lstm_kernel(%arg0: memref<8x1xf32, #tpu.memory_space<vmem>>, %arg1: memref<1x512xf32, #tpu.memory_space<vmem>>, %arg2: memref<128x512xbf16, #tpu.memory_space<any>>, %arg3: memref<1x512xf32, #tpu.memory_space<vmem>>, %arg4: memref<1x128xf32, #tpu.memory_space<vmem>>, %arg5: memref<1x1xf32, #tpu.memory_space<vmem>>, %arg6: memref<1x1xf32, #tpu.memory_space<vmem>>, %arg7: memref<128x512xbf16, #tpu.memory_space<vmem>>, %arg8: memref<!tpu.dma_semaphore, #tpu.memory_space<semaphore_mem>>) attributes {dimension_semantics = [], scalar_prefetch = 0 : i64, scratch_operands = 2 : i64, tpu.core_type = #tpu.core_type<tc>} {
    tpu.enqueue_dma source(%arg2 : memref<128x512xbf16, #tpu.memory_space<any>>) target(%arg7 : memref<128x512xbf16, #tpu.memory_space<vmem>>) target_semaphore(%arg8 : memref<!tpu.dma_semaphore, #tpu.memory_space<semaphore_mem>>)
    %c0 = arith.constant 0 : index
    %c0_0 = arith.constant 0 : index
    %0 = vector.load %arg0[%c0, %c0_0] : memref<8x1xf32, #tpu.memory_space<vmem>>, vector<8x1xf32>
    %c0_1 = arith.constant 0 : index
    %c0_2 = arith.constant 0 : index
    %1 = vector.load %arg1[%c0_1, %c0_2] : memref<1x512xf32, #tpu.memory_space<vmem>>, vector<1x512xf32>
    %2 = vector.broadcast %0 : vector<8x1xf32> to vector<8x512xf32>
    %3 = vector.broadcast %1 : vector<1x512xf32> to vector<8x512xf32>
    %4 = arith.mulf %2, %3 : vector<8x512xf32>
    %c0_3 = arith.constant 0 : index
    %c0_4 = arith.constant 0 : index
    %5 = vector.load %arg3[%c0_3, %c0_4] : memref<1x512xf32, #tpu.memory_space<vmem>>, vector<1x512xf32>
    %6 = vector.broadcast %5 : vector<1x512xf32> to vector<8x512xf32>
    %7 = arith.addf %4, %6 : vector<8x512xf32>
    tpu.wait_dma2 semaphore(%arg8 : memref<!tpu.dma_semaphore, #tpu.memory_space<semaphore_mem>>) src(%arg2 : memref<128x512xbf16, #tpu.memory_space<any>>) dst(%arg7 : memref<128x512xbf16, #tpu.memory_space<vmem>>)
    %cst = arith.constant 0.000000e+00 : f32
    %8 = vector.broadcast %cst : f32 to vector<1x128xf32>
    %cst_5 = arith.constant 0.000000e+00 : f32
    %9 = vector.broadcast %cst_5 : f32 to vector<1x128xf32>
    %10 = vector.extract_strided_slice %7 {offsets = [0, 0], sizes = [1, 512], strides = [1, 1]} : vector<8x512xf32> to vector<1x512xf32>
    %11 = arith.truncf %8 : vector<1x128xf32> to vector<1x128xbf16>
    %c0_6 = arith.constant 0 : index
    %c0_7 = arith.constant 0 : index
    %12 = vector.load %arg7[%c0_6, %c0_7] : memref<128x512xbf16, #tpu.memory_space<vmem>>, vector<128x512xbf16>
    %cst_8 = arith.constant dense<0.000000e+00> : vector<1x512xf32>
    %13 = tpu.matmul %11, %12, %cst_8 {dimension_numbers = #tpu.dot_dimension_numbers<[1], [0], [0], [1], [0, 0, 1, 1], [], []>} : vector<1x128xbf16>, vector<128x512xbf16>, vector<1x512xf32> -> vector<1x512xf32>
    %14 = arith.addf %10, %13 : vector<1x512xf32>
    %15 = arith.negf %14 : vector<1x512xf32>
    %16 = math.exp %15 : vector<1x512xf32>
    %cst_9 = arith.constant 1.000000e+00 : f32
    %17 = vector.broadcast %cst_9 : f32 to vector<1x512xf32>
    %18 = arith.addf %17, %16 : vector<1x512xf32>
    %19 = arith.divf %17, %18 : vector<1x512xf32>
    %20 = vector.extract_strided_slice %19 {offsets = [0, 0], sizes = [1, 128], strides = [1, 1]} : vector<1x512xf32> to vector<1x128xf32>
    %21 = vector.extract_strided_slice %19 {offsets = [0, 128], sizes = [1, 128], strides = [1, 1]} : vector<1x512xf32> to vector<1x128xf32>
    %22 = vector.extract_strided_slice %19 {offsets = [0, 256], sizes = [1, 128], strides = [1, 1]} : vector<1x512xf32> to vector<1x128xf32>
    %cst_10 = arith.constant 2.000000e+00 : f32
    %23 = vector.broadcast %cst_10 : f32 to vector<1x128xf32>
    %24 = arith.mulf %23, %22 : vector<1x128xf32>
    %cst_11 = arith.constant 1.000000e+00 : f32
    %25 = vector.broadcast %cst_11 : f32 to vector<1x128xf32>
    %26 = arith.subf %24, %25 : vector<1x128xf32>
    %27 = vector.extract_strided_slice %19 {offsets = [0, 384], sizes = [1, 128], strides = [1, 1]} : vector<1x512xf32> to vector<1x128xf32>
    %28 = arith.mulf %21, %9 : vector<1x128xf32>
    %29 = arith.mulf %20, %26 : vector<1x128xf32>
    %30 = arith.addf %28, %29 : vector<1x128xf32>
    %31 = math.tanh %30 : vector<1x128xf32>
    %32 = arith.mulf %27, %31 : vector<1x128xf32>
    %33 = vector.extract_strided_slice %7 {offsets = [1, 0], sizes = [1, 512], strides = [1, 1]} : vector<8x512xf32> to vector<1x512xf32>
    %34 = arith.truncf %32 : vector<1x128xf32> to vector<1x128xbf16>
    %c0_12 = arith.constant 0 : index
    %c0_13 = arith.constant 0 : index
    %35 = vector.load %arg7[%c0_12, %c0_13] : memref<128x512xbf16, #tpu.memory_space<vmem>>, vector<128x512xbf16>
    %cst_14 = arith.constant dense<0.000000e+00> : vector<1x512xf32>
    %36 = tpu.matmul %34, %35, %cst_14 {dimension_numbers = #tpu.dot_dimension_numbers<[1], [0], [0], [1], [0, 0, 1, 1], [], []>} : vector<1x128xbf16>, vector<128x512xbf16>, vector<1x512xf32> -> vector<1x512xf32>
    %37 = arith.addf %33, %36 : vector<1x512xf32>
    %38 = arith.negf %37 : vector<1x512xf32>
    %39 = math.exp %38 : vector<1x512xf32>
    %cst_15 = arith.constant 1.000000e+00 : f32
    %40 = vector.broadcast %cst_15 : f32 to vector<1x512xf32>
    %41 = arith.addf %40, %39 : vector<1x512xf32>
    %42 = arith.divf %40, %41 : vector<1x512xf32>
    %43 = vector.extract_strided_slice %42 {offsets = [0, 0], sizes = [1, 128], strides = [1, 1]} : vector<1x512xf32> to vector<1x128xf32>
    %44 = vector.extract_strided_slice %42 {offsets = [0, 128], sizes = [1, 128], strides = [1, 1]} : vector<1x512xf32> to vector<1x128xf32>
    %45 = vector.extract_strided_slice %42 {offsets = [0, 256], sizes = [1, 128], strides = [1, 1]} : vector<1x512xf32> to vector<1x128xf32>
    %cst_16 = arith.constant 2.000000e+00 : f32
    %46 = vector.broadcast %cst_16 : f32 to vector<1x128xf32>
    %47 = arith.mulf %46, %45 : vector<1x128xf32>
    %cst_17 = arith.constant 1.000000e+00 : f32
    %48 = vector.broadcast %cst_17 : f32 to vector<1x128xf32>
    %49 = arith.subf %47, %48 : vector<1x128xf32>
    %50 = vector.extract_strided_slice %42 {offsets = [0, 384], sizes = [1, 128], strides = [1, 1]} : vector<1x512xf32> to vector<1x128xf32>
    %51 = arith.mulf %44, %30 : vector<1x128xf32>
    %52 = arith.mulf %43, %49 : vector<1x128xf32>
    %53 = arith.addf %51, %52 : vector<1x128xf32>
    %54 = math.tanh %53 : vector<1x128xf32>
    %55 = arith.mulf %50, %54 : vector<1x128xf32>
    %56 = vector.extract_strided_slice %7 {offsets = [2, 0], sizes = [1, 512], strides = [1, 1]} : vector<8x512xf32> to vector<1x512xf32>
    %57 = arith.truncf %55 : vector<1x128xf32> to vector<1x128xbf16>
    %c0_18 = arith.constant 0 : index
    %c0_19 = arith.constant 0 : index
    %58 = vector.load %arg7[%c0_18, %c0_19] : memref<128x512xbf16, #tpu.memory_space<vmem>>, vector<128x512xbf16>
    %cst_20 = arith.constant dense<0.000000e+00> : vector<1x512xf32>
    %59 = tpu.matmul %57, %58, %cst_20 {dimension_numbers = #tpu.dot_dimension_numbers<[1], [0], [0], [1], [0, 0, 1, 1], [], []>} : vector<1x128xbf16>, vector<128x512xbf16>, vector<1x512xf32> -> vector<1x512xf32>
    %60 = arith.addf %56, %59 : vector<1x512xf32>
    %61 = arith.negf %60 : vector<1x512xf32>
    %62 = math.exp %61 : vector<1x512xf32>
    %cst_21 = arith.constant 1.000000e+00 : f32
    %63 = vector.broadcast %cst_21 : f32 to vector<1x512xf32>
    %64 = arith.addf %63, %62 : vector<1x512xf32>
    %65 = arith.divf %63, %64 : vector<1x512xf32>
    %66 = vector.extract_strided_slice %65 {offsets = [0, 0], sizes = [1, 128], strides = [1, 1]} : vector<1x512xf32> to vector<1x128xf32>
    %67 = vector.extract_strided_slice %65 {offsets = [0, 128], sizes = [1, 128], strides = [1, 1]} : vector<1x512xf32> to vector<1x128xf32>
    %68 = vector.extract_strided_slice %65 {offsets = [0, 256], sizes = [1, 128], strides = [1, 1]} : vector<1x512xf32> to vector<1x128xf32>
    %cst_22 = arith.constant 2.000000e+00 : f32
    %69 = vector.broadcast %cst_22 : f32 to vector<1x128xf32>
    %70 = arith.mulf %69, %68 : vector<1x128xf32>
    %cst_23 = arith.constant 1.000000e+00 : f32
    %71 = vector.broadcast %cst_23 : f32 to vector<1x128xf32>
    %72 = arith.subf %70, %71 : vector<1x128xf32>
    %73 = vector.extract_strided_slice %65 {offsets = [0, 384], sizes = [1, 128], strides = [1, 1]} : vector<1x512xf32> to vector<1x128xf32>
    %74 = arith.mulf %67, %53 : vector<1x128xf32>
    %75 = arith.mulf %66, %72 : vector<1x128xf32>
    %76 = arith.addf %74, %75 : vector<1x128xf32>
    %77 = math.tanh %76 : vector<1x128xf32>
    %78 = arith.mulf %73, %77 : vector<1x128xf32>
    %79 = vector.extract_strided_slice %7 {offsets = [3, 0], sizes = [1, 512], strides = [1, 1]} : vector<8x512xf32> to vector<1x512xf32>
    %80 = arith.truncf %78 : vector<1x128xf32> to vector<1x128xbf16>
    %c0_24 = arith.constant 0 : index
    %c0_25 = arith.constant 0 : index
    %81 = vector.load %arg7[%c0_24, %c0_25] : memref<128x512xbf16, #tpu.memory_space<vmem>>, vector<128x512xbf16>
    %cst_26 = arith.constant dense<0.000000e+00> : vector<1x512xf32>
    %82 = tpu.matmul %80, %81, %cst_26 {dimension_numbers = #tpu.dot_dimension_numbers<[1], [0], [0], [1], [0, 0, 1, 1], [], []>} : vector<1x128xbf16>, vector<128x512xbf16>, vector<1x512xf32> -> vector<1x512xf32>
    %83 = arith.addf %79, %82 : vector<1x512xf32>
    %84 = arith.negf %83 : vector<1x512xf32>
    %85 = math.exp %84 : vector<1x512xf32>
    %cst_27 = arith.constant 1.000000e+00 : f32
    %86 = vector.broadcast %cst_27 : f32 to vector<1x512xf32>
    %87 = arith.addf %86, %85 : vector<1x512xf32>
    %88 = arith.divf %86, %87 : vector<1x512xf32>
    %89 = vector.extract_strided_slice %88 {offsets = [0, 0], sizes = [1, 128], strides = [1, 1]} : vector<1x512xf32> to vector<1x128xf32>
    %90 = vector.extract_strided_slice %88 {offsets = [0, 128], sizes = [1, 128], strides = [1, 1]} : vector<1x512xf32> to vector<1x128xf32>
    %91 = vector.extract_strided_slice %88 {offsets = [0, 256], sizes = [1, 128], strides = [1, 1]} : vector<1x512xf32> to vector<1x128xf32>
    %cst_28 = arith.constant 2.000000e+00 : f32
    %92 = vector.broadcast %cst_28 : f32 to vector<1x128xf32>
    %93 = arith.mulf %92, %91 : vector<1x128xf32>
    %cst_29 = arith.constant 1.000000e+00 : f32
    %94 = vector.broadcast %cst_29 : f32 to vector<1x128xf32>
    %95 = arith.subf %93, %94 : vector<1x128xf32>
    %96 = vector.extract_strided_slice %88 {offsets = [0, 384], sizes = [1, 128], strides = [1, 1]} : vector<1x512xf32> to vector<1x128xf32>
    %97 = arith.mulf %90, %76 : vector<1x128xf32>
    %98 = arith.mulf %89, %95 : vector<1x128xf32>
    %99 = arith.addf %97, %98 : vector<1x128xf32>
    %100 = math.tanh %99 : vector<1x128xf32>
    %101 = arith.mulf %96, %100 : vector<1x128xf32>
    %102 = vector.extract_strided_slice %7 {offsets = [4, 0], sizes = [1, 512], strides = [1, 1]} : vector<8x512xf32> to vector<1x512xf32>
    %103 = arith.truncf %101 : vector<1x128xf32> to vector<1x128xbf16>
    %c0_30 = arith.constant 0 : index
    %c0_31 = arith.constant 0 : index
    %104 = vector.load %arg7[%c0_30, %c0_31] : memref<128x512xbf16, #tpu.memory_space<vmem>>, vector<128x512xbf16>
    %cst_32 = arith.constant dense<0.000000e+00> : vector<1x512xf32>
    %105 = tpu.matmul %103, %104, %cst_32 {dimension_numbers = #tpu.dot_dimension_numbers<[1], [0], [0], [1], [0, 0, 1, 1], [], []>} : vector<1x128xbf16>, vector<128x512xbf16>, vector<1x512xf32> -> vector<1x512xf32>
    %106 = arith.addf %102, %105 : vector<1x512xf32>
    %107 = arith.negf %106 : vector<1x512xf32>
    %108 = math.exp %107 : vector<1x512xf32>
    %cst_33 = arith.constant 1.000000e+00 : f32
    %109 = vector.broadcast %cst_33 : f32 to vector<1x512xf32>
    %110 = arith.addf %109, %108 : vector<1x512xf32>
    %111 = arith.divf %109, %110 : vector<1x512xf32>
    %112 = vector.extract_strided_slice %111 {offsets = [0, 0], sizes = [1, 128], strides = [1, 1]} : vector<1x512xf32> to vector<1x128xf32>
    %113 = vector.extract_strided_slice %111 {offsets = [0, 128], sizes = [1, 128], strides = [1, 1]} : vector<1x512xf32> to vector<1x128xf32>
    %114 = vector.extract_strided_slice %111 {offsets = [0, 256], sizes = [1, 128], strides = [1, 1]} : vector<1x512xf32> to vector<1x128xf32>
    %cst_34 = arith.constant 2.000000e+00 : f32
    %115 = vector.broadcast %cst_34 : f32 to vector<1x128xf32>
    %116 = arith.mulf %115, %114 : vector<1x128xf32>
    %cst_35 = arith.constant 1.000000e+00 : f32
    %117 = vector.broadcast %cst_35 : f32 to vector<1x128xf32>
    %118 = arith.subf %116, %117 : vector<1x128xf32>
    %119 = vector.extract_strided_slice %111 {offsets = [0, 384], sizes = [1, 128], strides = [1, 1]} : vector<1x512xf32> to vector<1x128xf32>
    %120 = arith.mulf %113, %99 : vector<1x128xf32>
    %121 = arith.mulf %112, %118 : vector<1x128xf32>
    %122 = arith.addf %120, %121 : vector<1x128xf32>
    %123 = math.tanh %122 : vector<1x128xf32>
    %124 = arith.mulf %119, %123 : vector<1x128xf32>
    %125 = vector.extract_strided_slice %7 {offsets = [5, 0], sizes = [1, 512], strides = [1, 1]} : vector<8x512xf32> to vector<1x512xf32>
    %126 = arith.truncf %124 : vector<1x128xf32> to vector<1x128xbf16>
    %c0_36 = arith.constant 0 : index
    %c0_37 = arith.constant 0 : index
    %127 = vector.load %arg7[%c0_36, %c0_37] : memref<128x512xbf16, #tpu.memory_space<vmem>>, vector<128x512xbf16>
    %cst_38 = arith.constant dense<0.000000e+00> : vector<1x512xf32>
    %128 = tpu.matmul %126, %127, %cst_38 {dimension_numbers = #tpu.dot_dimension_numbers<[1], [0], [0], [1], [0, 0, 1, 1], [], []>} : vector<1x128xbf16>, vector<128x512xbf16>, vector<1x512xf32> -> vector<1x512xf32>
    %129 = arith.addf %125, %128 : vector<1x512xf32>
    %130 = arith.negf %129 : vector<1x512xf32>
    %131 = math.exp %130 : vector<1x512xf32>
    %cst_39 = arith.constant 1.000000e+00 : f32
    %132 = vector.broadcast %cst_39 : f32 to vector<1x512xf32>
    %133 = arith.addf %132, %131 : vector<1x512xf32>
    %134 = arith.divf %132, %133 : vector<1x512xf32>
    %135 = vector.extract_strided_slice %134 {offsets = [0, 0], sizes = [1, 128], strides = [1, 1]} : vector<1x512xf32> to vector<1x128xf32>
    %136 = vector.extract_strided_slice %134 {offsets = [0, 128], sizes = [1, 128], strides = [1, 1]} : vector<1x512xf32> to vector<1x128xf32>
    %137 = vector.extract_strided_slice %134 {offsets = [0, 256], sizes = [1, 128], strides = [1, 1]} : vector<1x512xf32> to vector<1x128xf32>
    %cst_40 = arith.constant 2.000000e+00 : f32
    %138 = vector.broadcast %cst_40 : f32 to vector<1x128xf32>
    %139 = arith.mulf %138, %137 : vector<1x128xf32>
    %cst_41 = arith.constant 1.000000e+00 : f32
    %140 = vector.broadcast %cst_41 : f32 to vector<1x128xf32>
    %141 = arith.subf %139, %140 : vector<1x128xf32>
    %142 = vector.extract_strided_slice %134 {offsets = [0, 384], sizes = [1, 128], strides = [1, 1]} : vector<1x512xf32> to vector<1x128xf32>
    %143 = arith.mulf %136, %122 : vector<1x128xf32>
    %144 = arith.mulf %135, %141 : vector<1x128xf32>
    %145 = arith.addf %143, %144 : vector<1x128xf32>
    %146 = math.tanh %145 : vector<1x128xf32>
    %147 = arith.mulf %142, %146 : vector<1x128xf32>
    %148 = vector.extract_strided_slice %7 {offsets = [6, 0], sizes = [1, 512], strides = [1, 1]} : vector<8x512xf32> to vector<1x512xf32>
    %149 = arith.truncf %147 : vector<1x128xf32> to vector<1x128xbf16>
    %c0_42 = arith.constant 0 : index
    %c0_43 = arith.constant 0 : index
    %150 = vector.load %arg7[%c0_42, %c0_43] : memref<128x512xbf16, #tpu.memory_space<vmem>>, vector<128x512xbf16>
    %cst_44 = arith.constant dense<0.000000e+00> : vector<1x512xf32>
    %151 = tpu.matmul %149, %150, %cst_44 {dimension_numbers = #tpu.dot_dimension_numbers<[1], [0], [0], [1], [0, 0, 1, 1], [], []>} : vector<1x128xbf16>, vector<128x512xbf16>, vector<1x512xf32> -> vector<1x512xf32>
    %152 = arith.addf %148, %151 : vector<1x512xf32>
    %153 = arith.negf %152 : vector<1x512xf32>
    %154 = math.exp %153 : vector<1x512xf32>
    %cst_45 = arith.constant 1.000000e+00 : f32
    %155 = vector.broadcast %cst_45 : f32 to vector<1x512xf32>
    %156 = arith.addf %155, %154 : vector<1x512xf32>
    %157 = arith.divf %155, %156 : vector<1x512xf32>
    %158 = vector.extract_strided_slice %157 {offsets = [0, 0], sizes = [1, 128], strides = [1, 1]} : vector<1x512xf32> to vector<1x128xf32>
    %159 = vector.extract_strided_slice %157 {offsets = [0, 128], sizes = [1, 128], strides = [1, 1]} : vector<1x512xf32> to vector<1x128xf32>
    %160 = vector.extract_strided_slice %157 {offsets = [0, 256], sizes = [1, 128], strides = [1, 1]} : vector<1x512xf32> to vector<1x128xf32>
    %cst_46 = arith.constant 2.000000e+00 : f32
    %161 = vector.broadcast %cst_46 : f32 to vector<1x128xf32>
    %162 = arith.mulf %161, %160 : vector<1x128xf32>
    %cst_47 = arith.constant 1.000000e+00 : f32
    %163 = vector.broadcast %cst_47 : f32 to vector<1x128xf32>
    %164 = arith.subf %162, %163 : vector<1x128xf32>
    %165 = vector.extract_strided_slice %157 {offsets = [0, 384], sizes = [1, 128], strides = [1, 1]} : vector<1x512xf32> to vector<1x128xf32>
    %166 = arith.mulf %159, %145 : vector<1x128xf32>
    %167 = arith.mulf %158, %164 : vector<1x128xf32>
    %168 = arith.addf %166, %167 : vector<1x128xf32>
    %169 = math.tanh %168 : vector<1x128xf32>
    %170 = arith.mulf %165, %169 : vector<1x128xf32>
    %171 = vector.extract_strided_slice %7 {offsets = [7, 0], sizes = [1, 512], strides = [1, 1]} : vector<8x512xf32> to vector<1x512xf32>
    %172 = arith.truncf %170 : vector<1x128xf32> to vector<1x128xbf16>
    %c0_48 = arith.constant 0 : index
    %c0_49 = arith.constant 0 : index
    %173 = vector.load %arg7[%c0_48, %c0_49] : memref<128x512xbf16, #tpu.memory_space<vmem>>, vector<128x512xbf16>
    %cst_50 = arith.constant dense<0.000000e+00> : vector<1x512xf32>
    %174 = tpu.matmul %172, %173, %cst_50 {dimension_numbers = #tpu.dot_dimension_numbers<[1], [0], [0], [1], [0, 0, 1, 1], [], []>} : vector<1x128xbf16>, vector<128x512xbf16>, vector<1x512xf32> -> vector<1x512xf32>
    %175 = arith.addf %171, %174 : vector<1x512xf32>
    %176 = arith.negf %175 : vector<1x512xf32>
    %177 = math.exp %176 : vector<1x512xf32>
    %cst_51 = arith.constant 1.000000e+00 : f32
    %178 = vector.broadcast %cst_51 : f32 to vector<1x512xf32>
    %179 = arith.addf %178, %177 : vector<1x512xf32>
    %180 = arith.divf %178, %179 : vector<1x512xf32>
    %181 = vector.extract_strided_slice %180 {offsets = [0, 0], sizes = [1, 128], strides = [1, 1]} : vector<1x512xf32> to vector<1x128xf32>
    %182 = vector.extract_strided_slice %180 {offsets = [0, 128], sizes = [1, 128], strides = [1, 1]} : vector<1x512xf32> to vector<1x128xf32>
    %183 = vector.extract_strided_slice %180 {offsets = [0, 256], sizes = [1, 128], strides = [1, 1]} : vector<1x512xf32> to vector<1x128xf32>
    %cst_52 = arith.constant 2.000000e+00 : f32
    %184 = vector.broadcast %cst_52 : f32 to vector<1x128xf32>
    %185 = arith.mulf %184, %183 : vector<1x128xf32>
    %cst_53 = arith.constant 1.000000e+00 : f32
    %186 = vector.broadcast %cst_53 : f32 to vector<1x128xf32>
    %187 = arith.subf %185, %186 : vector<1x128xf32>
    %188 = vector.extract_strided_slice %180 {offsets = [0, 384], sizes = [1, 128], strides = [1, 1]} : vector<1x512xf32> to vector<1x128xf32>
    %189 = arith.mulf %182, %168 : vector<1x128xf32>
    %190 = arith.mulf %181, %187 : vector<1x128xf32>
    %191 = arith.addf %189, %190 : vector<1x128xf32>
    %192 = math.tanh %191 : vector<1x128xf32>
    %193 = arith.mulf %188, %192 : vector<1x128xf32>
    %c0_54 = arith.constant 0 : index
    %c0_55 = arith.constant 0 : index
    %194 = vector.load %arg4[%c0_54, %c0_55] : memref<1x128xf32, #tpu.memory_space<vmem>>, vector<1x128xf32>
    %195 = arith.mulf %193, %194 : vector<1x128xf32>
    %cst_56 = arith.constant dense<0.000000e+00> : vector<1xf32>
    %196 = vector.multi_reduction <add>, %195, %cst_56 [1] : vector<1x128xf32> to vector<1xf32>
    %197 = vector.shape_cast %196 : vector<1xf32> to vector<1x1xf32>
    %c0_57 = arith.constant 0 : index
    %c0_58 = arith.constant 0 : index
    %198 = vector.load %arg5[%c0_57, %c0_58] : memref<1x1xf32, #tpu.memory_space<vmem>>, vector<1x1xf32>
    %199 = arith.addf %197, %198 : vector<1x1xf32>
    %c0_59 = arith.constant 0 : index
    %c0_60 = arith.constant 0 : index
    %200 = vector.load %arg6[%c0_59, %c0_60] : memref<1x1xf32, #tpu.memory_space<vmem>>, vector<1x1xf32>
    tpu.vector_store %arg6[%c0_59, %c0_60], %199 {strides = array<i32>} : memref<1x1xf32, #tpu.memory_space<vmem>>, vector<1x1xf32>,
    return
  }
}

</mosaic_0001>

<bundles_post_ra>
// kernel: lstm_forward_pallas.1
= control target key start
LH: loop header
LB: loop body
LE: loop exit
PB: predicated region body
PF: predicated region fallthrough
CT: control target
= control target key end

     0   :  { %s2210_s0 = inlined_call_operand.vmem [shape: f32[8,1], index: 0, kind: input, shape index: {}]   ;;  %s2211_s1 = inlined_call_operand.vmem [shape: f32[1,512], index: 1, kind: input, shape index: {}]   ;;  %s2212_s2 = inlined_call_operand.hbm [shape: bf16[128,512], index: 2, kind: input, shape index: {}]   ;;  %s2213_s3 = inlined_call_operand.vmem [shape: f32[1,512], index: 3, kind: input, shape index: {}]   ;;  %s2214_s4 = inlined_call_operand.vmem [shape: f32[1,128], index: 4, kind: input, shape index: {}]   ;;  %s2215_s5 = inlined_call_operand.<no memory space> [shape: f32[1,1], index: 5, kind: input, shape index: {}]   ;;  %s2216_s6 = inlined_call_operand.hbm [shape: f32[1,1], index: 6, kind: output, shape index: {}]  }
   0x1   :  { %v11_v0 = vstv %s2215_s5 }
   0x2   :  { %12 = vst [vmem:[#allocation4] sm:$0x1] %v11_v0 }
   0x3   :  { %v36_v1 = vld [vmem:[%s2210_s0] sm:$0xff]  ;;  %v1750_v2 = vmov 0  }
   0x4   :  { %1481 = vset.pattern.permute.xlu0 %v1750_v2 }
   0x5   :  { %13 = vsyncpa [#allocation6], 0  ;;  %40 = vperm.xlu0 %1481, %v36_v1   ;;  %s1751_s25 = smov [#allocation2]  }
   0x6   :  { %s32_s26 = sshll.u32 %s1751_s25, 4  ;;  %s33_s26 = int_to_ptr.vmem [resolvable:$true] %s32_s26 }
   0x7   :  { %s1714_s27 = scalar_lea.vmem %s33_s26, 4096  ;;  %p1719_p1 = scmp.lt.s32.totalorder %s33_s26, %s33_s26 }
   0x8   :  { %p1715_p0 = scmp.ne.s32.totalorder %s33_s26, %s1714_s27  ;;  %p1720_p2 = scmp.lt.s32.totalorder %s1714_s27, %s1714_s27 }
   0xa   :  { %p1721_p3 = por %p1720_p2, %p1719_p1 }
   0xc   :  { %p1722_p4 = pnand %p1721_p3, %p1715_p0 }
   0xe   :  { %1725 = shalt.err (!%p1722_p4)  }
   0xf   :  { %35 = dma.hbm_to_vmem [thread:$0]  %s2212_s2, 4096, %s33_s26, [#allocation3]  ;;  %v44_v3 = vlaneseq  ;;  %v37_v9 = vld [vmem:[%s2211_s1] sm:$0xf] }
  0x10   :  { %v68_v10 = vld [vmem:[%s2213_s3] sm:$0xf] }
  0x11   :  { %v45_v4 = vshrl.u32 %v44_v3, 7 }
  0x13   :  { %v46_v5 = vsub.s32 0, %v45_v4  ;;  %v50_v6 = vsub.s32 1, %v45_v4  ;;  %v54_v7 = vsub.s32 2, %v45_v4  ;;  %v58_v8 = vsub.s32 3, %v45_v4 }
  0x15   :  { %v47_v11 = vrot.slane %v37_v9, %v46_v5  ;;  %v51_v12 = vrot.slane %v37_v9, %v50_v6  ;;  %v55_v13 = vrot.slane %v37_v9, %v54_v7  ;;  %v59_v14 = vrot.slane %v37_v9, %v58_v8 }
  0x16   :  { %v73_v15 = vrot.slane %v68_v10, %v46_v5  ;;  %v77_v16 = vrot.slane %v68_v10, %v50_v6  ;;  %v81_v17 = vrot.slane %v68_v10, %v54_v7  ;;  %v85_v18 = vrot.slane %v68_v10, %v58_v8 }
  0x80   :  { %v41_v19 = vpop.permute.xlu0 %40 }
  0x81   :  { %v64_v20 = vmul.f32 %v47_v11, %v41_v19  ;;  %v65_v21 = vmul.f32 %v51_v12, %v41_v19  ;;  %v66_v22 = vmul.f32 %v55_v13, %v41_v19  ;;  %v67_v23 = vmul.f32 %v59_v14, %v41_v19 }
  0x83   :  { %v1804_v24 = vadd.f32 %v73_v15, %v64_v20  ;;  %v1806_v25 = vadd.f32 %v77_v16, %v65_v21  ;;  %v1808_v26 = vadd.f32 %v81_v17, %v66_v22  ;;  %v1810_v27 = vadd.f32 %v85_v18, %v67_v23 }
  0x84   :  { %1746 = dma.done.wait [#allocation3], 4096 }
  0x85   :  { %1747 = vsyncadd [#allocation3], 4294963200  ;;  %322 = vmatprep.mubr.bf16.mxu0 %v1750_v2  ;;  %363 = vmatprep.mubr.bf16.mxu1 %v1750_v2  ;;  %v1814_v28 = vld [vmem:[#allocation2 + $0xe4] ss:$16 sps:$4 sm:$0xff]   ;;  %v1816_v29 = vld [vmem:[#allocation2 + $0xec] ss:$16 sps:$4 sm:$0xff]  }
  0x86   :  { %290 = vmatprep.subr.bf16.mxu0 %v1814_v28  ;;  %v1819_v30 = vld [vmem:[#allocation2 + $0xe0] ss:$16 sps:$4 sm:$0xff]   ;;  %v1821_v31 = vld [vmem:[#allocation2 + $0xe8] ss:$16 sps:$4 sm:$0xff]   ;;  %331 = vmatprep.subr.bf16.mxu1 %v1816_v29  ;;  %v1824_v32 = vld [vmem:[#allocation2 + $0xc4] ss:$16 sps:$4 sm:$0xff]  }
  0x87   :  { %291 = vmatpush1.bf16.msra.mxu0 %v1819_v30  ;;  %332 = vmatpush1.bf16.msra.mxu1 %v1821_v31  ;;  %v1828_v33 = vld [vmem:[#allocation2 + $0xcc] ss:$16 sps:$4 sm:$0xff]   ;;  %v1830_v34 = vld [vmem:[#allocation2 + $0xc0] ss:$16 sps:$4 sm:$0xff]   ;;  %v1833_v35 = vld [vmem:[#allocation2 + $0xc8] ss:$16 sps:$4 sm:$0xff]  }
  0x88   :  { %292 = vmatprep.subr.bf16.mxu0 %v1824_v32  ;;  %333 = vmatprep.subr.bf16.mxu1 %v1828_v33  ;;  %v1836_v36 = vld [vmem:[#allocation2 + $0xa4] ss:$16 sps:$4 sm:$0xff]   ;;  %v1838_v37 = vld [vmem:[#allocation2 + $0xac] ss:$16 sps:$4 sm:$0xff]   ;;  %v1840_v38 = vld [vmem:[#allocation2 + $0xa0] ss:$16 sps:$4 sm:$0xff]  }
  0x89   :  { %v1842_v39 = vld [vmem:[#allocation2 + $0xa8] ss:$16 sps:$4 sm:$0xff]   ;;  %v1846_v40 = vld [vmem:[#allocation2 + $0x84] ss:$16 sps:$4 sm:$0xff]   ;;  %v1850_v41 = vld [vmem:[#allocation2 + $0x8c] ss:$16 sps:$4 sm:$0xff]  }
  0x8a   :  { %v1852_v42 = vld [vmem:[#allocation2 + $0x80] ss:$16 sps:$4 sm:$0xff]   ;;  %v1856_v43 = vld [vmem:[#allocation2 + $0x88] ss:$16 sps:$4 sm:$0xff]   ;;  %v1858_v44 = vld [vmem:[#allocation2 + $0x64] ss:$16 sps:$4 sm:$0xff]  }
  0x8b   :  { %293 = vmatpush1.bf16.msra.mxu0 %v1830_v34  ;;  %334 = vmatpush1.bf16.msra.mxu1 %v1833_v35  ;;  %v1862_v45 = vld [vmem:[#allocation2 + $0x6c] ss:$16 sps:$4 sm:$0xff]   ;;  %v1864_v46 = vld [vmem:[#allocation2 + $0x60] ss:$16 sps:$4 sm:$0xff]   ;;  %v1866_v47 = vld [vmem:[#allocation2 + $0x68] ss:$16 sps:$4 sm:$0xff]  }
  0x8c   :  { %294 = vmatprep.subr.bf16.mxu0 %v1836_v36  ;;  %335 = vmatprep.subr.bf16.mxu1 %v1838_v37  ;;  %v1870_v48 = vld [vmem:[#allocation2 + $0x44] ss:$16 sps:$4 sm:$0xff]   ;;  %v1874_v49 = vld [vmem:[#allocation2 + $0x4c] ss:$16 sps:$4 sm:$0xff]   ;;  %v1878_v50 = vld [vmem:[#allocation2 + $0x40] ss:$16 sps:$4 sm:$0xff]  }
  0x8d   :  { %v1880_v51 = vld [vmem:[#allocation2 + $0x48] ss:$16 sps:$4 sm:$0xff]   ;;  %v1884_v52 = vld [vmem:[#allocation2 + $0x24] ss:$16 sps:$4 sm:$0xff]   ;;  %v1886_v53 = vld [vmem:[#allocation2 + $0x2c] ss:$16 sps:$4 sm:$0xff]  }
  0x8e   :  { %v1890_v54 = vld [vmem:[#allocation2 + $0x20] ss:$16 sps:$4 sm:$0xff]   ;;  %v1892_v55 = vld [vmem:[#allocation2 + $0x28] ss:$16 sps:$4 sm:$0xff]   ;;  %v1896_v56 = vld [vmem:[#allocation2 + $0x4] ss:$16 sps:$4 sm:$0xff]  }
  0x8f   :  { %295 = vmatpush1.bf16.msra.mxu0 %v1840_v38  ;;  %336 = vmatpush1.bf16.msra.mxu1 %v1842_v39  ;;  %v1898_v57 = vld [vmem:[#allocation2 + $0xc] ss:$16 sps:$4 sm:$0xff]   ;;  %v1902_v58 = vld [vmem:[#allocation2] ss:$16 sps:$4 sm:$0xff]   ;;  %v1904_v59 = vld [vmem:[#allocation2 + $0x8] ss:$16 sps:$4 sm:$0xff]  }
  0x90   :  { %296 = vmatprep.subr.bf16.mxu0 %v1846_v40  ;;  %337 = vmatprep.subr.bf16.mxu1 %v1850_v41  ;;  %vm1369_vm0 = vcmask 1047559   ;;  %s1752_s3 = smov [#allocation5]   ;;  %vm1381_vm1 = vcmask 7175  }
  0x91   :  { %s1389_s8 = sshll.u32 %s1752_s3, 4  ;;  %s1390_s8 = int_to_ptr.vmem [resolvable:$true] %s1389_s8 }
  0x92   :  { %s1726_s9 = scalar_lea.vmem %s1390_s8, 16  ;;  %s1730_s10 = scalar_lea.vmem %s1390_s8, 32 }
  0x93   :  { %297 = vmatpush1.bf16.msra.mxu0 %v1852_v42  ;;  %338 = vmatpush1.bf16.msra.mxu1 %v1856_v43  ;;  %p1727_p5 = scmp.ne.s32.totalorder %s1390_s8, %s1726_s9  ;;  %p1731_p6 = scmp.lt.s32.totalorder %s1390_s8, %s1390_s8 }
  0x94   :  { %298 = vmatprep.subr.bf16.mxu0 %v1858_v44  ;;  %339 = vmatprep.subr.bf16.mxu1 %v1862_v45  ;;  %p1732_p7 = scmp.lt.s32.totalorder %s1730_s10, %s1726_s9 }
  0x96   :  { %p1733_p8 = por %p1732_p7, %p1731_p6 }
  0x97   :  { %299 = vmatpush1.bf16.msra.mxu0 %v1864_v46  ;;  %340 = vmatpush1.bf16.msra.mxu1 %v1866_v47 }
  0x98   :  { %300 = vmatprep.subr.bf16.mxu0 %v1870_v48  ;;  %341 = vmatprep.subr.bf16.mxu1 %v1874_v49  ;;  %p1734_p9 = pnand %p1733_p8, %p1727_p5 }
  0x9b   :  { %301 = vmatpush1.bf16.msra.mxu0 %v1878_v50  ;;  %342 = vmatpush1.bf16.msra.mxu1 %v1880_v51 }
  0x9c   :  { %302 = vmatprep.subr.bf16.mxu0 %v1884_v52  ;;  %343 = vmatprep.subr.bf16.mxu1 %v1886_v53 }
  0x9f   :  { %303 = vmatpush1.bf16.msra.mxu0 %v1890_v54  ;;  %344 = vmatpush1.bf16.msra.mxu1 %v1892_v55 }
  0xa0   :  { %304 = vmatprep.subr.bf16.mxu0 %v1896_v56  ;;  %345 = vmatprep.subr.bf16.mxu1 %v1898_v57 }
  0xa3   :  { %305 = vmatpush1.bf16.msra.mxu0 %v1902_v58  ;;  %346 = vmatpush1.bf16.msra.mxu1 %v1904_v59 }
  0xa4   :  { %408 = vmatprep.subr.bf16.mxu0 %v1814_v28  ;;  %449 = vmatprep.subr.bf16.mxu1 %v1816_v29 }
  0xa6   :  { %323 = vmatmul.mubr.bf16.vlgmr.msra.gmra.mxu0 %v1750_v2  ;;  %364 = vmatmul.mubr.bf16.vlgmr.msra.gmra.mxu1 %v1750_v2 }
  0xa7   :  { %409 = vmatpush1.bf16.msra.mxu0 %v1819_v30  ;;  %450 = vmatpush1.bf16.msra.mxu1 %v1821_v31 }
  0xa8   :  { %410 = vmatprep.subr.bf16.mxu0 %v1824_v32  ;;  %451 = vmatprep.subr.bf16.mxu1 %v1828_v33 }
  0xa9   :  { %440 = vmatprep.mubr.bf16.mxu0 %v1750_v2  ;;  %481 = vmatprep.mubr.bf16.mxu1 %v1750_v2 }
  0xab   :  { %411 = vmatpush1.bf16.msra.mxu0 %v1830_v34  ;;  %452 = vmatpush1.bf16.msra.mxu1 %v1833_v35 }
  0xac   :  { %412 = vmatprep.subr.bf16.mxu0 %v1836_v36  ;;  %453 = vmatprep.subr.bf16.mxu1 %v1838_v37 }
  0xaf   :  { %413 = vmatpush1.bf16.msra.mxu0 %v1840_v38  ;;  %454 = vmatpush1.bf16.msra.mxu1 %v1842_v39 }
  0xb0   :  { %414 = vmatprep.subr.bf16.mxu0 %v1846_v40  ;;  %455 = vmatprep.subr.bf16.mxu1 %v1850_v41 }
  0xb3   :  { %415 = vmatpush1.bf16.msra.mxu0 %v1852_v42  ;;  %456 = vmatpush1.bf16.msra.mxu1 %v1856_v43 }
  0xb4   :  { %416 = vmatprep.subr.bf16.mxu0 %v1858_v44  ;;  %457 = vmatprep.subr.bf16.mxu1 %v1862_v45 }
  0xb7   :  { %417 = vmatpush1.bf16.msra.mxu0 %v1864_v46  ;;  %458 = vmatpush1.bf16.msra.mxu1 %v1866_v47 }
  0xb8   :  { %418 = vmatprep.subr.bf16.mxu0 %v1870_v48  ;;  %459 = vmatprep.subr.bf16.mxu1 %v1874_v49 }
  0xbb   :  { %419 = vmatpush1.bf16.msra.mxu0 %v1878_v50  ;;  %460 = vmatpush1.bf16.msra.mxu1 %v1880_v51 }
  0xbc   :  { %420 = vmatprep.subr.bf16.mxu0 %v1884_v52  ;;  %461 = vmatprep.subr.bf16.mxu1 %v1886_v53 }
  0xbf   :  { %421 = vmatpush1.bf16.msra.mxu0 %v1890_v54  ;;  %462 = vmatpush1.bf16.msra.mxu1 %v1892_v55 }
  0xc0   :  { %422 = vmatprep.subr.bf16.mxu0 %v1896_v56  ;;  %463 = vmatprep.subr.bf16.mxu1 %v1898_v57 }
  0xc3   :  { %423 = vmatpush1.bf16.msra.mxu0 %v1902_v58  ;;  %464 = vmatpush1.bf16.msra.mxu1 %v1904_v59 }
  0xc4   :  { %545 = vmatprep.subr.bf16.mxu0 %v1814_v28  ;;  %586 = vmatprep.subr.bf16.mxu1 %v1816_v29 }
 0x166   :  { %v324_v60 = vpop.f32.mrf.mxu0  ;;  %v365_v61 = vpop.f32.mrf.mxu1 }
 0x167   :  { %v372_v62 = vadd.f32 %v324_v60, %v1804_v24  ;;  %v374_v63 = vadd.f32 %v365_v61, %v1808_v26 }
 0x168   :  { %v326_v0 = vpop.f32.mrf.mxu0  ;;  %v367_v1 = vpop.f32.mrf.mxu1 }
 0x169   :  { %v1435_v3 = vmul.f32 -1.442695, %v372_v62  ;;  %v1437_v4 = vmul.f32 -1.442695, %v374_v63  ;;  %v373_v5 = vadd.f32 %v326_v0, %v1806_v25  ;;  %v375_v11 = vadd.f32 %v367_v1, %v1810_v27 }
 0x16a   :  { %v328_v6 = vpop.f32.mrf.mxu0  ;;  %v369_v7 = vpop.f32.mrf.mxu1 }
 0x16b   :  { %1530 = vpow2.f32 %v1435_v3  ;;  %v1436_v8 = vmul.f32 -1.442695, %v373_v5  ;;  %v1438_v14 = vmul.f32 -1.442695, %v375_v11 }
 0x16c   :  { %1532 = vpow2.f32 %v1437_v4  ;;  %v329_v9 = vpop.f32.mrf.mxu0  ;;  %v370_v10 = vpop.f32.mrf.mxu1 }
 0x16d   :  { %1534 = vpow2.f32 %v1436_v8 }
 0x178   :  { %v1531_v12 = vpop.eup %1530 }
 0x179   :  { %v1533_v13 = vpop.eup %1532  ;;  %v388_v18 = vadd.f32 1.0, %v1531_v12 }
 0x17a   :  { %v1535_v15 = vpop.eup %1534  ;;  %v390_v16 = vadd.f32 1.0, %v1533_v13 }
 0x17b   :  { %v389_v17 = vadd.f32 1.0, %v1535_v15 }
 0x17c   :  { %1536 = vrcp.f32 %v390_v16 }
 0x17d   :  { %1538 = vpow2.f32 %v1438_v14 }
 0x17e   :  { %1540 = vrcp.f32 %v389_v17 }
 0x17f   :  { %1542 = vrcp.f32 %v388_v18 }
 0x189   :  { %v1537_v19 = vpop.eup %1536 }
 0x18a   :  { %v1539_v20 = vpop.eup %1538  ;;  %v400_v21 = vmul.f32 2.0, %v1537_v19 }
 0x18b   :  { %v1541_v22 = vpop.eup %1540  ;;  %v391_v61 = vadd.f32 1.0, %v1539_v20 }
 0x18c   :  { %v1439_v23 = vadd.f32 -1.0, %v400_v21  ;;  %v1543_v60 = vpop.eup %1542  ;;  %v402_v63 = vmul.f32 0.0, %v1541_v22 }
 0x18d   :  { %1544 = vrcp.f32 %v391_v61 }
 0x18e   :  { %v403_v62 = vmul.f32 %v1543_v60, %v1439_v23 }
 0x190   :  { %v1952_v0 = vadd.f32 %v403_v62, %v402_v63 }
 0x192   :  { %1546 = vtanh.f32 %v1952_v0 }
 0x19a   :  { %v1545_v1 = vpop.eup %1544 }
 0x19f   :  { %v1547_v3 = vpop.eup %1546 }
 0x1a0   :  { %v406_v4 = vmul.f32 %v1547_v3, %v1545_v1 }
 0x1a2   :  { %v407_v5 = vpack.c.bf16 %v406_v4, %v406_v4 }
 0x1a4   :  { %441 = vmatmul.mubr.bf16.vlgmr.msra.gmra.mxu0 %v407_v5  ;;  %482 = vmatmul.mubr.bf16.vlgmr.msra.gmra.mxu1 %v407_v5 }
 0x1a5   :  { %546 = vmatpush1.bf16.msra.mxu0 %v1819_v30  ;;  %587 = vmatpush1.bf16.msra.mxu1 %v1821_v31 }
 0x1a6   :  { %547 = vmatprep.subr.bf16.mxu0 %v1824_v32  ;;  %588 = vmatprep.subr.bf16.mxu1 %v1828_v33 }
 0x1a7   :  { %577 = vmatprep.mubr.bf16.mxu0 %v1750_v2  ;;  %618 = vmatprep.mubr.bf16.mxu1 %v1750_v2 }
 0x1a9   :  { %548 = vmatpush1.bf16.msra.mxu0 %v1830_v34  ;;  %589 = vmatpush1.bf16.msra.mxu1 %v1833_v35 }
 0x1aa   :  { %549 = vmatprep.subr.bf16.mxu0 %v1836_v36  ;;  %590 = vmatprep.subr.bf16.mxu1 %v1838_v37 }
 0x1ad   :  { %550 = vmatpush1.bf16.msra.mxu0 %v1840_v38  ;;  %591 = vmatpush1.bf16.msra.mxu1 %v1842_v39 }
 0x1ae   :  { %551 = vmatprep.subr.bf16.mxu0 %v1846_v40  ;;  %592 = vmatprep.subr.bf16.mxu1 %v1850_v41 }
 0x1b1   :  { %552 = vmatpush1.bf16.msra.mxu0 %v1852_v42  ;;  %593 = vmatpush1.bf16.msra.mxu1 %v1856_v43 }
 0x1b2   :  { %553 = vmatprep.subr.bf16.mxu0 %v1858_v44  ;;  %594 = vmatprep.subr.bf16.mxu1 %v1862_v45 }
 0x1b5   :  { %554 = vmatpush1.bf16.msra.mxu0 %v1864_v46  ;;  %595 = vmatpush1.bf16.msra.mxu1 %v1866_v47 }
 0x1b6   :  { %555 = vmatprep.subr.bf16.mxu0 %v1870_v48  ;;  %596 = vmatprep.subr.bf16.mxu1 %v1874_v49 }
 0x1b9   :  { %556 = vmatpush1.bf16.msra.mxu0 %v1878_v50  ;;  %597 = vmatpush1.bf16.msra.mxu1 %v1880_v51 }
 0x1ba   :  { %557 = vmatprep.subr.bf16.mxu0 %v1884_v52  ;;  %598 = vmatprep.subr.bf16.mxu1 %v1886_v53 }
 0x1bd   :  { %558 = vmatpush1.bf16.msra.mxu0 %v1890_v54  ;;  %599 = vmatpush1.bf16.msra.mxu1 %v1892_v55 }
 0x1be   :  { %559 = vmatprep.subr.bf16.mxu0 %v1896_v56  ;;  %600 = vmatprep.subr.bf16.mxu1 %v1898_v57 }
 0x1c1   :  { %560 = vmatpush1.bf16.msra.mxu0 %v1902_v58  ;;  %601 = vmatpush1.bf16.msra.mxu1 %v1904_v59 }
 0x1c2   :  { %681 = vmatprep.subr.bf16.mxu0 %v1814_v28  ;;  %722 = vmatprep.subr.bf16.mxu1 %v1816_v29 }
 0x264   :  { %v442_v6 = vpop.f32.mrf.mxu0  ;;  %v483_v7 = vpop.f32.mrf.mxu1 }
 0x265   :  { %v494_v8 = vrot.slane %v442_v6, 7  ;;  %v496_v9 = vrot.slane %v483_v7, 7 }
 0x266   :  { %v444_v10 = vpop.f32.mrf.mxu0  ;;  %v485_v11 = vpop.f32.mrf.mxu1 }
 0x267   :  { %v502_v12 = vadd.f32 %v494_v8, %v1804_v24  ;;  %v504_v13 = vadd.f32 %v496_v9, %v1808_v26  ;;  %v495_v14 = vrot.slane %v444_v10, 7  ;;  %v497_v23 = vrot.slane %v485_v11, 7 }
 0x268   :  { %v446_v15 = vpop.f32.mrf.mxu0  ;;  %v487_v16 = vpop.f32.mrf.mxu1  ;;  %v533_v10 = vrot.slane %v1952_v0, 7 }
 0x269   :  { %v1440_v17 = vmul.f32 -1.442695, %v502_v12  ;;  %v1442_v18 = vmul.f32 -1.442695, %v504_v13  ;;  %v503_v19 = vadd.f32 %v495_v14, %v1806_v25  ;;  %v505_v60 = vadd.f32 %v497_v23, %v1810_v27 }
 0x26a   :  { %v447_v20 = vpop.f32.mrf.mxu0  ;;  %v488_v21 = vpop.f32.mrf.mxu1 }
 0x26b   :  { %1548 = vpow2.f32 %v1440_v17  ;;  %v1441_v22 = vmul.f32 -1.442695, %v503_v19  ;;  %v1443_v63 = vmul.f32 -1.442695, %v505_v60 }
 0x26c   :  { %1550 = vpow2.f32 %v1442_v18 }
 0x26d   :  { %1552 = vpow2.f32 %v1441_v22 }
 0x278   :  { %v1549_v61 = vpop.eup %1548 }
 0x279   :  { %v1551_v62 = vpop.eup %1550  ;;  %v518_v5 = vadd.f32 1.0, %v1549_v61 }
 0x27a   :  { %v1553_v1 = vpop.eup %1552  ;;  %v520_v3 = vadd.f32 1.0, %v1551_v62 }
 0x27b   :  { %v519_v4 = vadd.f32 1.0, %v1553_v1 }
 0x27c   :  { %1554 = vrcp.f32 %v520_v3 }
 0x27d   :  { %1556 = vpow2.f32 %v1443_v63 }
 0x27e   :  { %1558 = vrcp.f32 %v519_v4 }
 0x27f   :  { %1560 = vrcp.f32 %v518_v5 }
 0x289   :  { %v1555_v6 = vpop.eup %1554 }
 0x28a   :  { %v1557_v7 = vpop.eup %1556  ;;  %v530_v8 = vmul.f32 2.0, %v1555_v6 }
 0x28b   :  { %v1559_v9 = vpop.eup %1558  ;;  %v521_v13 = vadd.f32 1.0, %v1557_v7 }
 0x28c   :  { %v1444_v11 = vadd.f32 -1.0, %v530_v8  ;;  %v1561_v12 = vpop.eup %1560  ;;  %v535_v15 = vmul.f32 %v1559_v9, %v533_v10 }
 0x28d   :  { %1562 = vrcp.f32 %v521_v13 }
 0x28e   :  { %v536_v14 = vmul.f32 %v1561_v12, %v1444_v11 }
 0x290   :  { %v1994_v16 = vadd.f32 %v536_v14, %v535_v15 }
 0x292   :  { %1564 = vtanh.f32 %v1994_v16 }
 0x29a   :  { %v1563_v17 = vpop.eup %1562 }
 0x29f   :  { %v1565_v18 = vpop.eup %1564 }
 0x2a0   :  { %v539_v19 = vmul.f32 %v1565_v18, %v1563_v17 }
 0x2a2   :  { %v540_v20 = vpack.c.bf16 %v539_v19, %v539_v19 }
 0x2a4   :  { %v542_v21 = vshrl.u32 %v540_v20, 16 }
 0x2a6   :  { %578 = vmatmul.mubr.bf16.vlgmr.msra.gmra.mxu0 %v542_v21  ;;  %619 = vmatmul.mubr.bf16.vlgmr.msra.gmra.mxu1 %v542_v21 }
 0x2a7   :  { %682 = vmatpush1.bf16.msra.mxu0 %v1819_v30  ;;  %723 = vmatpush1.bf16.msra.mxu1 %v1821_v31 }
 0x2a8   :  { %683 = vmatprep.subr.bf16.mxu0 %v1824_v32  ;;  %724 = vmatprep.subr.bf16.mxu1 %v1828_v33 }
 0x2a9   :  { %713 = vmatprep.mubr.bf16.mxu0 %v1750_v2  ;;  %754 = vmatprep.mubr.bf16.mxu1 %v1750_v2 }
 0x2ab   :  { %684 = vmatpush1.bf16.msra.mxu0 %v1830_v34  ;;  %725 = vmatpush1.bf16.msra.mxu1 %v1833_v35 }
 0x2ac   :  { %685 = vmatprep.subr.bf16.mxu0 %v1836_v36  ;;  %726 = vmatprep.subr.bf16.mxu1 %v1838_v37 }
 0x2af   :  { %686 = vmatpush1.bf16.msra.mxu0 %v1840_v38  ;;  %727 = vmatpush1.bf16.msra.mxu1 %v1842_v39 }
 0x2b0   :  { %687 = vmatprep.subr.bf16.mxu0 %v1846_v40  ;;  %728 = vmatprep.subr.bf16.mxu1 %v1850_v41 }
 0x2b3   :  { %688 = vmatpush1.bf16.msra.mxu0 %v1852_v42  ;;  %729 = vmatpush1.bf16.msra.mxu1 %v1856_v43 }
 0x2b4   :  { %689 = vmatprep.subr.bf16.mxu0 %v1858_v44  ;;  %730 = vmatprep.subr.bf16.mxu1 %v1862_v45 }
 0x2b7   :  { %690 = vmatpush1.bf16.msra.mxu0 %v1864_v46  ;;  %731 = vmatpush1.bf16.msra.mxu1 %v1866_v47 }
 0x2b8   :  { %691 = vmatprep.subr.bf16.mxu0 %v1870_v48  ;;  %732 = vmatprep.subr.bf16.mxu1 %v1874_v49 }
 0x2bb   :  { %692 = vmatpush1.bf16.msra.mxu0 %v1878_v50  ;;  %733 = vmatpush1.bf16.msra.mxu1 %v1880_v51 }
 0x2bc   :  { %693 = vmatprep.subr.bf16.mxu0 %v1884_v52  ;;  %734 = vmatprep.subr.bf16.mxu1 %v1886_v53 }
 0x2bf   :  { %694 = vmatpush1.bf16.msra.mxu0 %v1890_v54  ;;  %735 = vmatpush1.bf16.msra.mxu1 %v1892_v55 }
 0x2c0   :  { %695 = vmatprep.subr.bf16.mxu0 %v1896_v56  ;;  %736 = vmatprep.subr.bf16.mxu1 %v1898_v57 }
 0x2c3   :  { %696 = vmatpush1.bf16.msra.mxu0 %v1902_v58  ;;  %737 = vmatpush1.bf16.msra.mxu1 %v1904_v59 }
 0x2c4   :  { %819 = vmatprep.subr.bf16.mxu0 %v1814_v28  ;;  %860 = vmatprep.subr.bf16.mxu1 %v1816_v29 }
 0x366   :  { %v579_v0 = vpop.f32.mrf.mxu0  ;;  %v620_v22 = vpop.f32.mrf.mxu1 }
 0x367   :  { %v631_v23 = vrot.slane %v579_v0, 6  ;;  %v633_v60 = vrot.slane %v620_v22, 6 }
 0x368   :  { %v581_v61 = vpop.f32.mrf.mxu0  ;;  %v622_v62 = vpop.f32.mrf.mxu1 }
 0x369   :  { %v639_v63 = vadd.f32 %v631_v23, %v1804_v24  ;;  %v641_v1 = vadd.f32 %v633_v60, %v1808_v26  ;;  %v632_v3 = vrot.slane %v581_v61, 6  ;;  %v634_v12 = vrot.slane %v622_v62, 6 }
 0x36a   :  { %v583_v4 = vpop.f32.mrf.mxu0  ;;  %v624_v5 = vpop.f32.mrf.mxu1  ;;  %v670_v62 = vrot.slane %v1994_v16, 7 }
 0x36b   :  { %v1445_v6 = vmul.f32 -1.442695, %v639_v63  ;;  %v1447_v7 = vmul.f32 -1.442695, %v641_v1  ;;  %v640_v8 = vadd.f32 %v632_v3, %v1806_v25  ;;  %v642_v13 = vadd.f32 %v634_v12, %v1810_v27 }
 0x36c   :  { %v584_v9 = vpop.f32.mrf.mxu0  ;;  %v625_v10 = vpop.f32.mrf.mxu1 }
 0x36d   :  { %1566 = vpow2.f32 %v1445_v6  ;;  %v1446_v11 = vmul.f32 -1.442695, %v640_v8  ;;  %v1448_v17 = vmul.f32 -1.442695, %v642_v13 }
 0x36e   :  { %1568 = vpow2.f32 %v1447_v7 }
 0x36f   :  { %1570 = vpow2.f32 %v1446_v11 }
 0x37a   :  { %v1567_v14 = vpop.eup %1566 }
 0x37b   :  { %v1569_v15 = vpop.eup %1568  ;;  %v655_v21 = vadd.f32 1.0, %v1567_v14 }
 0x37c   :  { %v1571_v18 = vpop.eup %1570  ;;  %v657_v19 = vadd.f32 1.0, %v1569_v15 }
 0x37d   :  { %v656_v20 = vadd.f32 1.0, %v1571_v18 }
 0x37e   :  { %1572 = vrcp.f32 %v657_v19 }
 0x37f   :  { %1574 = vpow2.f32 %v1448_v17 }
 0x380   :  { %1576 = vrcp.f32 %v656_v20 }
 0x381   :  { %1578 = vrcp.f32 %v655_v21 }
 0x38b   :  { %v1573_v0 = vpop.eup %1572 }
 0x38c   :  { %v1575_v22 = vpop.eup %1574  ;;  %v667_v23 = vmul.f32 2.0, %v1573_v0 }
 0x38d   :  { %v1577_v60 = vpop.eup %1576  ;;  %v658_v1 = vadd.f32 1.0, %v1575_v22 }
 0x38e   :  { %v1449_v61 = vadd.f32 -1.0, %v667_v23  ;;  %v1579_v63 = vpop.eup %1578  ;;  %v672_v4 = vmul.f32 %v1577_v60, %v670_v62 }
 0x38f   :  { %1580 = vrcp.f32 %v658_v1 }
 0x390   :  { %v673_v3 = vmul.f32 %v1579_v63, %v1449_v61 }
 0x392   :  { %v2036_v5 = vadd.f32 %v673_v3, %v672_v4 }
 0x394   :  { %1582 = vtanh.f32 %v2036_v5 }
 0x39c   :  { %v1581_v6 = vpop.eup %1580 }
 0x3a1   :  { %v1583_v7 = vpop.eup %1582 }
 0x3a2   :  { %v676_v8 = vmul.f32 %v1583_v7, %v1581_v6 }
 0x3a4   :  { %v677_v9 = vpack.c.bf16 %v676_v8, %v676_v8 }
 0x3a6   :  { %v679_v10 = vrot.slane %v677_v9, 1 }
 0x3a8   :  { %714 = vmatmul.mubr.bf16.vlgmr.msra.gmra.mxu0 %v679_v10  ;;  %755 = vmatmul.mubr.bf16.vlgmr.msra.gmra.mxu1 %v679_v10 }
 0x3a9   :  { %820 = vmatpush1.bf16.msra.mxu0 %v1819_v30  ;;  %861 = vmatpush1.bf16.msra.mxu1 %v1821_v31 }
 0x3aa   :  { %821 = vmatprep.subr.bf16.mxu0 %v1824_v32  ;;  %862 = vmatprep.subr.bf16.mxu1 %v1828_v33 }
 0x3ab   :  { %851 = vmatprep.mubr.bf16.mxu0 %v1750_v2  ;;  %892 = vmatprep.mubr.bf16.mxu1 %v1750_v2 }
 0x3ad   :  { %822 = vmatpush1.bf16.msra.mxu0 %v1830_v34  ;;  %863 = vmatpush1.bf16.msra.mxu1 %v1833_v35 }
 0x3ae   :  { %823 = vmatprep.subr.bf16.mxu0 %v1836_v36  ;;  %864 = vmatprep.subr.bf16.mxu1 %v1838_v37 }
 0x3b1   :  { %824 = vmatpush1.bf16.msra.mxu0 %v1840_v38  ;;  %865 = vmatpush1.bf16.msra.mxu1 %v1842_v39 }
 0x3b2   :  { %825 = vmatprep.subr.bf16.mxu0 %v1846_v40  ;;  %866 = vmatprep.subr.bf16.mxu1 %v1850_v41 }
 0x3b5   :  { %826 = vmatpush1.bf16.msra.mxu0 %v1852_v42  ;;  %867 = vmatpush1.bf16.msra.mxu1 %v1856_v43 }
 0x3b6   :  { %827 = vmatprep.subr.bf16.mxu0 %v1858_v44  ;;  %868 = vmatprep.subr.bf16.mxu1 %v1862_v45 }
 0x3b9   :  { %828 = vmatpush1.bf16.msra.mxu0 %v1864_v46  ;;  %869 = vmatpush1.bf16.msra.mxu1 %v1866_v47 }
 0x3ba   :  { %829 = vmatprep.subr.bf16.mxu0 %v1870_v48  ;;  %870 = vmatprep.subr.bf16.mxu1 %v1874_v49 }
 0x3bd   :  { %830 = vmatpush1.bf16.msra.mxu0 %v1878_v50  ;;  %871 = vmatpush1.bf16.msra.mxu1 %v1880_v51 }
 0x3be   :  { %831 = vmatprep.subr.bf16.mxu0 %v1884_v52  ;;  %872 = vmatprep.subr.bf16.mxu1 %v1886_v53 }
 0x3c1   :  { %832 = vmatpush1.bf16.msra.mxu0 %v1890_v54  ;;  %873 = vmatpush1.bf16.msra.mxu1 %v1892_v55 }
 0x3c2   :  { %833 = vmatprep.subr.bf16.mxu0 %v1896_v56  ;;  %874 = vmatprep.subr.bf16.mxu1 %v1898_v57 }
 0x3c5   :  { %834 = vmatpush1.bf16.msra.mxu0 %v1902_v58  ;;  %875 = vmatpush1.bf16.msra.mxu1 %v1904_v59 }
 0x3c6   :  { %955 = vmatprep.subr.bf16.mxu0 %v1814_v28  ;;  %996 = vmatprep.subr.bf16.mxu1 %v1816_v29 }
 0x468   :  { %v715_v16 = vpop.f32.mrf.mxu0  ;;  %v756_v11 = vpop.f32.mrf.mxu1 }
 0x469   :  { %v767_v12 = vrot.slane %v715_v16, 5  ;;  %v769_v13 = vrot.slane %v756_v11, 5 }
 0x46a   :  { %v717_v14 = vpop.f32.mrf.mxu0  ;;  %v758_v15 = vpop.f32.mrf.mxu1 }
 0x46b   :  { %v775_v17 = vadd.f32 %v767_v12, %v1804_v24  ;;  %v777_v18 = vadd.f32 %v769_v13, %v1808_v26  ;;  %v768_v19 = vrot.slane %v717_v14, 5  ;;  %v770_v63 = vrot.slane %v758_v15, 5 }
 0x46c   :  { %v719_v20 = vpop.f32.mrf.mxu0  ;;  %v760_v21 = vpop.f32.mrf.mxu1  ;;  %v806_v15 = vrot.slane %v2036_v5, 7 }
 0x46d   :  { %v1450_v0 = vmul.f32 -1.442695, %v775_v17  ;;  %v1452_v22 = vmul.f32 -1.442695, %v777_v18  ;;  %v776_v23 = vadd.f32 %v768_v19, %v1806_v25  ;;  %v778_v1 = vadd.f32 %v770_v63, %v1810_v27 }
 0x46e   :  { %v720_v60 = vpop.f32.mrf.mxu0  ;;  %v761_v61 = vpop.f32.mrf.mxu1 }
 0x46f   :  { %1584 = vpow2.f32 %v1450_v0  ;;  %v1451_v62 = vmul.f32 -1.442695, %v776_v23  ;;  %v1453_v6 = vmul.f32 -1.442695, %v778_v1 }
 0x470   :  { %1586 = vpow2.f32 %v1452_v22 }
 0x471   :  { %1588 = vpow2.f32 %v1451_v62 }
 0x47c   :  { %v1585_v3 = vpop.eup %1584 }
 0x47d   :  { %v1587_v4 = vpop.eup %1586  ;;  %v791_v10 = vadd.f32 1.0, %v1585_v3 }
 0x47e   :  { %v1589_v7 = vpop.eup %1588  ;;  %v793_v8 = vadd.f32 1.0, %v1587_v4 }
 0x47f   :  { %v792_v9 = vadd.f32 1.0, %v1589_v7 }
 0x480   :  { %1590 = vrcp.f32 %v793_v8 }
 0x481   :  { %1592 = vpow2.f32 %v1453_v6 }
 0x482   :  { %1594 = vrcp.f32 %v792_v9 }
 0x483   :  { %1596 = vrcp.f32 %v791_v10 }
 0x48d   :  { %v1591_v16 = vpop.eup %1590 }
 0x48e   :  { %v1593_v11 = vpop.eup %1592  ;;  %v803_v12 = vmul.f32 2.0, %v1591_v16 }
 0x48f   :  { %v1595_v13 = vpop.eup %1594  ;;  %v794_v18 = vadd.f32 1.0, %v1593_v11 }
 0x490   :  { %v1454_v14 = vadd.f32 -1.0, %v803_v12  ;;  %v1597_v17 = vpop.eup %1596  ;;  %v808_v20 = vmul.f32 %v1595_v13, %v806_v15 }
 0x491   :  { %1598 = vrcp.f32 %v794_v18 }
 0x492   :  { %v809_v19 = vmul.f32 %v1597_v17, %v1454_v14 }
 0x494   :  { %v2078_v21 = vadd.f32 %v809_v19, %v808_v20 }
 0x496   :  { %1600 = vtanh.f32 %v2078_v21  ;;  %v944_v20 = vrot.slane %v2078_v21, 7  ;;  %v2126_v21 = vld [vmem:[#allocation2 + $0xe8] ss:$16 sps:$4 sm:$0xff]  }
 0x49e   :  { %v1599_v0 = vpop.eup %1598 }
 0x4a3   :  { %v1601_v22 = vpop.eup %1600 }
 0x4a4   :  { %v812_v23 = vmul.f32 %v1601_v22, %v1599_v0 }
 0x4a6   :  { %v813_v60 = vpack.c.bf16 %v812_v23, %v812_v23 }
 0x4a8   :  { %v815_v61 = vshrl.u32 %v813_v60, 16 }
 0x4aa   :  { %v817_v62 = vrot.slane %v815_v61, 1 }
 0x4ac   :  { %852 = vmatmul.mubr.bf16.vlgmr.msra.gmra.mxu0 %v817_v62  ;;  %893 = vmatmul.mubr.bf16.vlgmr.msra.gmra.mxu1 %v817_v62 }
 0x4ad   :  { %956 = vmatpush1.bf16.msra.mxu0 %v1819_v30  ;;  %997 = vmatpush1.bf16.msra.mxu1 %v1821_v31 }
 0x4ae   :  { %957 = vmatprep.subr.bf16.mxu0 %v1824_v32  ;;  %998 = vmatprep.subr.bf16.mxu1 %v1828_v33 }
 0x4af   :  { %987 = vmatprep.mubr.bf16.mxu0 %v1750_v2  ;;  %1028 = vmatprep.mubr.bf16.mxu1 %v1750_v2 }
 0x4b1   :  { %958 = vmatpush1.bf16.msra.mxu0 %v1830_v34  ;;  %999 = vmatpush1.bf16.msra.mxu1 %v1833_v35 }
 0x4b2   :  { %959 = vmatprep.subr.bf16.mxu0 %v1836_v36  ;;  %1000 = vmatprep.subr.bf16.mxu1 %v1838_v37 }
 0x4b5   :  { %960 = vmatpush1.bf16.msra.mxu0 %v1840_v38  ;;  %1001 = vmatpush1.bf16.msra.mxu1 %v1842_v39 }
 0x4b6   :  { %961 = vmatprep.subr.bf16.mxu0 %v1846_v40  ;;  %1002 = vmatprep.subr.bf16.mxu1 %v1850_v41 }
 0x4b9   :  { %962 = vmatpush1.bf16.msra.mxu0 %v1852_v42  ;;  %1003 = vmatpush1.bf16.msra.mxu1 %v1856_v43 }
 0x4ba   :  { %963 = vmatprep.subr.bf16.mxu0 %v1858_v44  ;;  %1004 = vmatprep.subr.bf16.mxu1 %v1862_v45 }
 0x4bd   :  { %964 = vmatpush1.bf16.msra.mxu0 %v1864_v46  ;;  %1005 = vmatpush1.bf16.msra.mxu1 %v1866_v47 }
 0x4be   :  { %965 = vmatprep.subr.bf16.mxu0 %v1870_v48  ;;  %1006 = vmatprep.subr.bf16.mxu1 %v1874_v49 }
 0x4c1   :  { %966 = vmatpush1.bf16.msra.mxu0 %v1878_v50  ;;  %1007 = vmatpush1.bf16.msra.mxu1 %v1880_v51 }
 0x4c2   :  { %967 = vmatprep.subr.bf16.mxu0 %v1884_v52  ;;  %1008 = vmatprep.subr.bf16.mxu1 %v1886_v53 }
 0x4c5   :  { %968 = vmatpush1.bf16.msra.mxu0 %v1890_v54  ;;  %1009 = vmatpush1.bf16.msra.mxu1 %v1892_v55 }
 0x4c6   :  { %969 = vmatprep.subr.bf16.mxu0 %v1896_v56  ;;  %1010 = vmatprep.subr.bf16.mxu1 %v1898_v57 }
 0x4c9   :  { %970 = vmatpush1.bf16.msra.mxu0 %v1902_v58  ;;  %1011 = vmatpush1.bf16.msra.mxu1 %v1904_v59 }
 0x4ca   :  { %1093 = vmatprep.subr.bf16.mxu0 %v1814_v28  ;;  %1134 = vmatprep.subr.bf16.mxu1 %v1816_v29 }
 0x56c   :  { %v853_v30 = vpop.f32.mrf.mxu0  ;;  %v894_v31 = vpop.f32.mrf.mxu1 }
 0x56d   :  { %v905_v32 = vrot.slane %v853_v30, 4  ;;  %v907_v33 = vrot.slane %v894_v31, 4 }
 0x56e   :  { %v855_v34 = vpop.f32.mrf.mxu0  ;;  %v896_v35 = vpop.f32.mrf.mxu1 }
 0x56f   :  { %v913_v36 = vadd.f32 %v905_v32, %v1804_v24  ;;  %v915_v37 = vadd.f32 %v907_v33, %v1808_v26  ;;  %v906_v38 = vrot.slane %v855_v34, 4  ;;  %v908_v6 = vrot.slane %v896_v35, 4  ;;  %v2123_v34 = vld [vmem:[#allocation2 + $0xe0] ss:$16 sps:$4 sm:$0xff]   ;;  %v2129_v35 = vld [vmem:[#allocation2 + $0xc4] ss:$16 sps:$4 sm:$0xff]  }
 0x570   :  { %v857_v39 = vpop.f32.mrf.mxu0  ;;  %v898_v5 = vpop.f32.mrf.mxu1 }
 0x571   :  { %v1455_v63 = vmul.f32 -1.442695, %v913_v36  ;;  %v1457_v1 = vmul.f32 -1.442695, %v915_v37  ;;  %v914_v3 = vadd.f32 %v906_v38, %v1806_v25  ;;  %v916_v7 = vadd.f32 %v908_v6, %v1810_v27  ;;  %v2132_v36 = vld [vmem:[#allocation2 + $0xcc] ss:$16 sps:$4 sm:$0xff]  }
 0x572   :  { %v858_v28 = vpop.f32.mrf.mxu0  ;;  %v899_v4 = vpop.f32.mrf.mxu1  ;;  %v2137_v37 = vld [vmem:[#allocation2 + $0xc0] ss:$16 sps:$4 sm:$0xff]   ;;  %v2140_v38 = vld [vmem:[#allocation2 + $0xc8] ss:$16 sps:$4 sm:$0xff]   ;;  %v2143_v39 = vld [vmem:[#allocation2 + $0xa4] ss:$16 sps:$4 sm:$0xff]  }
 0x573   :  { %1602 = vpow2.f32 %v1455_v63  ;;  %v1456_v29 = vmul.f32 -1.442695, %v914_v3  ;;  %v1458_v10 = vmul.f32 -1.442695, %v916_v7  ;;  %v2146_v5 = vld [vmem:[#allocation2 + $0xac] ss:$16 sps:$4 sm:$0xff]  }
 0x574   :  { %1604 = vpow2.f32 %v1457_v1  ;;  %v2149_v63 = vld [vmem:[#allocation2 + $0xa0] ss:$16 sps:$4 sm:$0xff]   ;;  %v2152_v1 = vld [vmem:[#allocation2 + $0xa8] ss:$16 sps:$4 sm:$0xff]  }
 0x575   :  { %1606 = vpow2.f32 %v1456_v29 }
 0x580   :  { %v1603_v8 = vpop.eup %1602 }
 0x581   :  { %v1605_v9 = vpop.eup %1604  ;;  %v929_v13 = vadd.f32 1.0, %v1603_v8 }
 0x582   :  { %v1607_v16 = vpop.eup %1606  ;;  %v931_v11 = vadd.f32 1.0, %v1605_v9 }
 0x583   :  { %v930_v12 = vadd.f32 1.0, %v1607_v16 }
 0x584   :  { %1608 = vrcp.f32 %v931_v11 }
 0x585   :  { %1610 = vpow2.f32 %v1458_v10 }
 0x586   :  { %1612 = vrcp.f32 %v930_v12 }
 0x587   :  { %1614 = vrcp.f32 %v929_v13 }
 0x591   :  { %v1609_v14 = vpop.eup %1608 }
 0x592   :  { %v1611_v15 = vpop.eup %1610  ;;  %v941_v17 = vmul.f32 2.0, %v1609_v14 }
 0x593   :  { %v1613_v18 = vpop.eup %1612  ;;  %v932_v22 = vadd.f32 1.0, %v1611_v15 }
 0x594   :  { %v1459_v19 = vadd.f32 -1.0, %v941_v17  ;;  %v1615_v0 = vpop.eup %1614  ;;  %v946_v60 = vmul.f32 %v1613_v18, %v944_v20 }
 0x595   :  { %1616 = vrcp.f32 %v932_v22 }
 0x596   :  { %v947_v23 = vmul.f32 %v1615_v0, %v1459_v19 }
 0x598   :  { %v2120_v61 = vadd.f32 %v947_v23, %v946_v60 }
 0x59a   :  { %1618 = vtanh.f32 %v2120_v61  ;;  %v1080_v14 = vrot.slane %v2120_v61, 7  ;;  %v1686_v61 = vld [vmem:[#allocation2 + $0x84] ss:$16 sps:$4 sm:$0xff]  }
 0x5a2   :  { %v1617_v62 = vpop.eup %1616 }
 0x5a7   :  { %v1619_v30 = vpop.eup %1618 }
 0x5a8   :  { %v950_v31 = vmul.f32 %v1619_v30, %v1617_v62 }
 0x5aa   :  { %v951_v32 = vpack.c.bf16 %v950_v31, %v950_v31  ;;  %v1687_v31 = vld [vmem:[#allocation2 + $0x8c] ss:$16 sps:$4 sm:$0xff]  }
 0x5ac   :  { %v953_v33 = vrot.slane %v951_v32, 2  ;;  %v1688_v32 = vld [vmem:[#allocation2 + $0x80] ss:$16 sps:$4 sm:$0xff]  }
 0x5ae   :  { %988 = vmatmul.mubr.bf16.vlgmr.msra.gmra.mxu0 %v953_v33  ;;  %1029 = vmatmul.mubr.bf16.vlgmr.msra.gmra.mxu1 %v953_v33  ;;  %v1689_v33 = vld [vmem:[#allocation2 + $0x88] ss:$16 sps:$4 sm:$0xff]  }
 0x5af   :  { %1094 = vmatpush1.bf16.msra.mxu0 %v2123_v34  ;;  %1135 = vmatpush1.bf16.msra.mxu1 %v2126_v21 }
 0x5b0   :  { %1095 = vmatprep.subr.bf16.mxu0 %v2129_v35  ;;  %1136 = vmatprep.subr.bf16.mxu1 %v2132_v36 }
 0x5b1   :  { %1125 = vmatprep.mubr.bf16.mxu0 %v1750_v2  ;;  %1166 = vmatprep.mubr.bf16.mxu1 %v1750_v2 }
 0x5b3   :  { %1096 = vmatpush1.bf16.msra.mxu0 %v2137_v37  ;;  %1137 = vmatpush1.bf16.msra.mxu1 %v2140_v38 }
 0x5b4   :  { %1097 = vmatprep.subr.bf16.mxu0 %v2143_v39  ;;  %1138 = vmatprep.subr.bf16.mxu1 %v2146_v5 }
 0x5b7   :  { %1098 = vmatpush1.bf16.msra.mxu0 %v2149_v63  ;;  %1139 = vmatpush1.bf16.msra.mxu1 %v2152_v1 }
 0x5b8   :  { %1099 = vmatprep.subr.bf16.mxu0 %v1846_v40  ;;  %1140 = vmatprep.subr.bf16.mxu1 %v1850_v41  ;;  %v1684_v40 = vld [vmem:[#allocation2 + $0xe4] ss:$16 sps:$4 sm:$0xff]   ;;  %v1685_v41 = vld [vmem:[#allocation2 + $0xec] ss:$16 sps:$4 sm:$0xff]  }
 0x5bb   :  { %1100 = vmatpush1.bf16.msra.mxu0 %v1852_v42  ;;  %1141 = vmatpush1.bf16.msra.mxu1 %v1856_v43 }
 0x5bc   :  { %1101 = vmatprep.subr.bf16.mxu0 %v1858_v44  ;;  %1142 = vmatprep.subr.bf16.mxu1 %v1862_v45 }
 0x5bf   :  { %1102 = vmatpush1.bf16.msra.mxu0 %v1864_v46  ;;  %1143 = vmatpush1.bf16.msra.mxu1 %v1866_v47 }
 0x5c0   :  { %1103 = vmatprep.subr.bf16.mxu0 %v1870_v48  ;;  %1144 = vmatprep.subr.bf16.mxu1 %v1874_v49 }
 0x5c3   :  { %1104 = vmatpush1.bf16.msra.mxu0 %v1878_v50  ;;  %1145 = vmatpush1.bf16.msra.mxu1 %v1880_v51 }
 0x5c4   :  { %1105 = vmatprep.subr.bf16.mxu0 %v1884_v52  ;;  %1146 = vmatprep.subr.bf16.mxu1 %v1886_v53 }
 0x5c7   :  { %1106 = vmatpush1.bf16.msra.mxu0 %v1890_v54  ;;  %1147 = vmatpush1.bf16.msra.mxu1 %v1892_v55 }
 0x5c8   :  { %1107 = vmatprep.subr.bf16.mxu0 %v1896_v56  ;;  %1148 = vmatprep.subr.bf16.mxu1 %v1898_v57 }
 0x5cb   :  { %1108 = vmatpush1.bf16.msra.mxu0 %v1902_v58  ;;  %1149 = vmatpush1.bf16.msra.mxu1 %v1904_v59 }
 0x5cc   :  { %1229 = vmatprep.subr.bf16.mxu0 %v1684_v40  ;;  %1270 = vmatprep.subr.bf16.mxu1 %v1685_v41  ;;  %v1701_v40 = vld [vmem:[#allocation2 + $0x28] ss:$16 sps:$4 sm:$0xff]   ;;  %v1702_v41 = vld [vmem:[#allocation2 + $0x4] ss:$16 sps:$4 sm:$0xff]  }
 0x66e   :  { %v989_v42 = vpop.f32.mrf.mxu0  ;;  %v1030_v43 = vpop.f32.mrf.mxu1 }
 0x66f   :  { %v1041_v44 = vrot.slane %v989_v42, 3  ;;  %v1043_v45 = vrot.slane %v1030_v43, 3  ;;  %v1703_v42 = vld [vmem:[#allocation2 + $0xc] ss:$16 sps:$4 sm:$0xff]   ;;  %v1704_v43 = vld [vmem:[#allocation2] ss:$16 sps:$4 sm:$0xff]  }
 0x670   :  { %v991_v46 = vpop.f32.mrf.mxu0  ;;  %v1032_v47 = vpop.f32.mrf.mxu1 }
 0x671   :  { %v1049_v48 = vadd.f32 %v1041_v44, %v1804_v24  ;;  %v1051_v49 = vadd.f32 %v1043_v45, %v1808_v26  ;;  %v1042_v50 = vrot.slane %v991_v46, 3  ;;  %v1044_v59 = vrot.slane %v1032_v47, 3  ;;  %v1705_v44 = vld [vmem:[#allocation2 + $0x8] ss:$16 sps:$4 sm:$0xff]  }
 0x672   :  { %v993_v51 = vpop.f32.mrf.mxu0  ;;  %v1034_v52 = vpop.f32.mrf.mxu1 }
 0x673   :  { %v1460_v53 = vmul.f32 -1.442695, %v1049_v48  ;;  %v1462_v54 = vmul.f32 -1.442695, %v1051_v49  ;;  %v1050_v55 = vadd.f32 %v1042_v50, %v1806_v25  ;;  %v1052_v3 = vadd.f32 %v1044_v59, %v1810_v27 }
 0x674   :  { %v994_v56 = vpop.f32.mrf.mxu0  ;;  %v1035_v57 = vpop.f32.mrf.mxu1 }
 0x675   :  { %1620 = vpow2.f32 %v1460_v53  ;;  %v1461_v58 = vmul.f32 -1.442695, %v1050_v55  ;;  %v1463_v29 = vmul.f32 -1.442695, %v1052_v3 }
 0x676   :  { %1622 = vpow2.f32 %v1462_v54 }
 0x677   :  { %1624 = vpow2.f32 %v1461_v58 }
 0x682   :  { %v1621_v28 = vpop.eup %1620 }
 0x683   :  { %v1623_v4 = vpop.eup %1622  ;;  %v1065_v9 = vadd.f32 1.0, %v1621_v28 }
 0x684   :  { %v1625_v6 = vpop.eup %1624  ;;  %v1067_v7 = vadd.f32 1.0, %v1623_v4 }
 0x685   :  { %v1066_v8 = vadd.f32 1.0, %v1625_v6 }
 0x686   :  { %1626 = vrcp.f32 %v1067_v7 }
 0x687   :  { %1628 = vpow2.f32 %v1463_v29 }
 0x688   :  { %1630 = vrcp.f32 %v1066_v8 }
 0x689   :  { %1632 = vrcp.f32 %v1065_v9 }
 0x693   :  { %v1627_v10 = vpop.eup %1626 }
 0x694   :  { %v1629_v16 = vpop.eup %1628  ;;  %v1077_v11 = vmul.f32 2.0, %v1627_v10 }
 0x695   :  { %v1631_v12 = vpop.eup %1630  ;;  %v1068_v17 = vadd.f32 1.0, %v1629_v16 }
 0x696   :  { %v1464_v13 = vadd.f32 -1.0, %v1077_v11  ;;  %v1633_v15 = vpop.eup %1632  ;;  %v1082_v19 = vmul.f32 %v1631_v12, %v1080_v14 }
 0x697   :  { %1634 = vrcp.f32 %v1068_v17 }
 0x698   :  { %v1083_v18 = vmul.f32 %v1633_v15, %v1464_v13 }
 0x69a   :  { %v2180_v20 = vadd.f32 %v1083_v18, %v1082_v19 }
 0x69c   :  { %1636 = vtanh.f32 %v2180_v20  ;;  %v1218_v18 = vrot.slane %v2180_v20, 7 }
 0x6a4   :  { %v1635_v0 = vpop.eup %1634 }
 0x6a9   :  { %v1637_v22 = vpop.eup %1636 }
 0x6aa   :  { %v1086_v23 = vmul.f32 %v1637_v22, %v1635_v0 }
 0x6ac   :  { %v1087_v60 = vpack.c.bf16 %v1086_v23, %v1086_v23 }
 0x6ae   :  { %v1089_v62 = vshrl.u32 %v1087_v60, 16 }
 0x6b0   :  { %v1091_v30 = vrot.slane %v1089_v62, 2 }
 0x6b2   :  { %1126 = vmatmul.mubr.bf16.vlgmr.msra.gmra.mxu0 %v1091_v30  ;;  %1167 = vmatmul.mubr.bf16.vlgmr.msra.gmra.mxu1 %v1091_v30 }
 0x6b3   :  { %1230 = vmatpush1.bf16.msra.mxu0 %v2123_v34  ;;  %1271 = vmatpush1.bf16.msra.mxu1 %v2126_v21  ;;  %v1691_v34 = vld [vmem:[#allocation2 + $0x6c] ss:$16 sps:$4 sm:$0xff]   ;;  %v1692_v21 = vld [vmem:[#allocation2 + $0x60] ss:$16 sps:$4 sm:$0xff]  }
 0x6b4   :  { %1231 = vmatprep.subr.bf16.mxu0 %v2129_v35  ;;  %1272 = vmatprep.subr.bf16.mxu1 %v2132_v36  ;;  %v1693_v35 = vld [vmem:[#allocation2 + $0x68] ss:$16 sps:$4 sm:$0xff]   ;;  %v1694_v36 = vld [vmem:[#allocation2 + $0x44] ss:$16 sps:$4 sm:$0xff]  }
 0x6b5   :  { %1261 = vmatprep.mubr.bf16.mxu0 %v1750_v2  ;;  %1302 = vmatprep.mubr.bf16.mxu1 %v1750_v2  ;;  %v1690_v2 = vld [vmem:[#allocation2 + $0x64] ss:$16 sps:$4 sm:$0xff]  }
 0x6b7   :  { %1232 = vmatpush1.bf16.msra.mxu0 %v2137_v37  ;;  %1273 = vmatpush1.bf16.msra.mxu1 %v2140_v38  ;;  %v1695_v37 = vld [vmem:[#allocation2 + $0x4c] ss:$16 sps:$4 sm:$0xff]   ;;  %v1696_v38 = vld [vmem:[#allocation2 + $0x40] ss:$16 sps:$4 sm:$0xff]  }
 0x6b8   :  { %1233 = vmatprep.subr.bf16.mxu0 %v2143_v39  ;;  %1274 = vmatprep.subr.bf16.mxu1 %v2146_v5  ;;  %v1697_v39 = vld [vmem:[#allocation2 + $0x48] ss:$16 sps:$4 sm:$0xff]   ;;  %v1698_v5 = vld [vmem:[#allocation2 + $0x24] ss:$16 sps:$4 sm:$0xff]  }
 0x6bb   :  { %1234 = vmatpush1.bf16.msra.mxu0 %v2149_v63  ;;  %1275 = vmatpush1.bf16.msra.mxu1 %v2152_v1  ;;  %v1699_v63 = vld [vmem:[#allocation2 + $0x2c] ss:$16 sps:$4 sm:$0xff]   ;;  %v1700_v1 = vld [vmem:[#allocation2 + $0x20] ss:$16 sps:$4 sm:$0xff]  }
 0x6bc   :  { %1235 = vmatprep.subr.bf16.mxu0 %v1686_v61  ;;  %1276 = vmatprep.subr.bf16.mxu1 %v1687_v31 }
 0x6bf   :  { %1236 = vmatpush1.bf16.msra.mxu0 %v1688_v32  ;;  %1277 = vmatpush1.bf16.msra.mxu1 %v1689_v33 }
 0x6c0   :  { %1237 = vmatprep.subr.bf16.mxu0 %v1690_v2  ;;  %1278 = vmatprep.subr.bf16.mxu1 %v1691_v34 }
 0x6c3   :  { %1238 = vmatpush1.bf16.msra.mxu0 %v1692_v21  ;;  %1279 = vmatpush1.bf16.msra.mxu1 %v1693_v35 }
 0x6c4   :  { %1239 = vmatprep.subr.bf16.mxu0 %v1694_v36  ;;  %1280 = vmatprep.subr.bf16.mxu1 %v1695_v37 }
 0x6c7   :  { %1240 = vmatpush1.bf16.msra.mxu0 %v1696_v38  ;;  %1281 = vmatpush1.bf16.msra.mxu1 %v1697_v39 }
 0x6c8   :  { %1241 = vmatprep.subr.bf16.mxu0 %v1698_v5  ;;  %1282 = vmatprep.subr.bf16.mxu1 %v1699_v63 }
 0x6cb   :  { %1242 = vmatpush1.bf16.msra.mxu0 %v1700_v1  ;;  %1283 = vmatpush1.bf16.msra.mxu1 %v1701_v40 }
 0x6cc   :  { %1243 = vmatprep.subr.bf16.mxu0 %v1702_v41  ;;  %1284 = vmatprep.subr.bf16.mxu1 %v1703_v42 }
 0x6cf   :  { %1244 = vmatpush1.bf16.msra.mxu0 %v1704_v43  ;;  %1285 = vmatpush1.bf16.msra.mxu1 %v1705_v44 }
 0x772   :  { %v1127_v45 = vpop.f32.mrf.mxu0  ;;  %v1168_v46 = vpop.f32.mrf.mxu1 }
 0x773   :  { %v1179_v47 = vrot.slane %v1127_v45, 2  ;;  %v1181_v48 = vrot.slane %v1168_v46, 2 }
 0x774   :  { %v1129_v49 = vpop.f32.mrf.mxu0  ;;  %v1170_v50 = vpop.f32.mrf.mxu1 }
 0x775   :  { %v1187_v51 = vadd.f32 %v1179_v47, %v1804_v24  ;;  %v1189_v52 = vadd.f32 %v1181_v48, %v1808_v26  ;;  %v1180_v53 = vrot.slane %v1129_v49, 2  ;;  %v1182_v4 = vrot.slane %v1170_v50, 2 }
 0x776   :  { %v1131_v54 = vpop.f32.mrf.mxu0  ;;  %v1172_v55 = vpop.f32.mrf.mxu1 }
 0x777   :  { %v1465_v56 = vmul.f32 -1.442695, %v1187_v51  ;;  %v1467_v57 = vmul.f32 -1.442695, %v1189_v52  ;;  %v1188_v58 = vadd.f32 %v1180_v53, %v1806_v25  ;;  %v1190_v29 = vadd.f32 %v1182_v4, %v1810_v27  ;;  %v1475_v4 = vld [vmem:[%s2214_s4] ss:$0 sm:$0xff] }
 0x778   :  { %v1132_v59 = vpop.f32.mrf.mxu0  ;;  %v1173_v3 = vpop.f32.mrf.mxu1 }
 0x779   :  { %1638 = vpow2.f32 %v1465_v56  ;;  %v1466_v28 = vmul.f32 -1.442695, %v1188_v58  ;;  %v1468_v8 = vmul.f32 -1.442695, %v1190_v29 }
 0x77a   :  { %1640 = vpow2.f32 %v1467_v57 }
 0x77b   :  { %1642 = vpow2.f32 %v1466_v28 }
 0x786   :  { %v1639_v6 = vpop.eup %1638 }
 0x787   :  { %v1641_v7 = vpop.eup %1640  ;;  %v1203_v11 = vadd.f32 1.0, %v1639_v6 }
 0x788   :  { %v1643_v9 = vpop.eup %1642  ;;  %v1205_v10 = vadd.f32 1.0, %v1641_v7 }
 0x789   :  { %v1204_v16 = vadd.f32 1.0, %v1643_v9 }
 0x78a   :  { %1644 = vrcp.f32 %v1205_v10 }
 0x78b   :  { %1646 = vpow2.f32 %v1468_v8  ;;  %v1476_v8 = vld [vmem:[#allocation4] ss:$0 sm:$0xff] }
 0x78c   :  { %1648 = vrcp.f32 %v1204_v16 }
 0x78d   :  { %1650 = vrcp.f32 %v1203_v11 }
 0x797   :  { %v1645_v12 = vpop.eup %1644 }
 0x798   :  { %v1647_v13 = vpop.eup %1646  ;;  %v1215_v14 = vmul.f32 2.0, %v1645_v12 }
 0x799   :  { %v1649_v15 = vpop.eup %1648  ;;  %v1206_v0 = vadd.f32 1.0, %v1647_v13 }
 0x79a   :  { %v1469_v17 = vadd.f32 -1.0, %v1215_v14  ;;  %v1651_v19 = vpop.eup %1650  ;;  %v1220_v23 = vmul.f32 %v1649_v15, %v1218_v18 }
 0x79b   :  { %1652 = vrcp.f32 %v1206_v0 }
 0x79c   :  { %v1221_v22 = vmul.f32 %v1651_v19, %v1469_v17 }
 0x79e   :  { %v1222_v60 = vadd.f32 %v1221_v22, %v1220_v23 }
 0x7a0   :  { %1654 = vtanh.f32 %v1222_v60  ;;  %v1354_v55 = vrot.slane %v1222_v60, 7 }
 0x7a8   :  { %v1653_v62 = vpop.eup %1652 }
 0x7ad   :  { %v1655_v30 = vpop.eup %1654 }
 0x7ae   :  { %v1224_v61 = vmul.f32 %v1655_v30, %v1653_v62 }
 0x7b0   :  { %v1225_v31 = vpack.c.bf16 %v1224_v61, %v1224_v61 }
 0x7b2   :  { %v1227_v32 = vrot.slane %v1225_v31, 3 }
 0x7b4   :  { %1262 = vmatmul.mubr.bf16.vlgmr.msra.gmra.mxu0 %v1227_v32  ;;  %1303 = vmatmul.mubr.bf16.vlgmr.msra.gmra.mxu1 %v1227_v32 }
 0x874   :  { %v1263_v33 = vpop.f32.mrf.mxu0  ;;  %v1304_v2 = vpop.f32.mrf.mxu1 }
 0x875   :  { %v1315_v34 = vrot.slane %v1263_v33, 1  ;;  %v1317_v21 = vrot.slane %v1304_v2, 1 }
 0x876   :  { %v1265_v35 = vpop.f32.mrf.mxu0  ;;  %v1306_v20 = vpop.f32.mrf.mxu1 }
 0x877   :  { %v1323_v36 = vadd.f32 %v1315_v34, %v1804_v24  ;;  %v1325_v37 = vadd.f32 %v1317_v21, %v1808_v26  ;;  %v1316_v38 = vrot.slane %v1265_v35, 1  ;;  %v1318_v44 = vrot.slane %v1306_v20, 1 }
 0x878   :  { %v1267_v39 = vpop.f32.mrf.mxu0  ;;  %v1308_v5 = vpop.f32.mrf.mxu1 }
 0x879   :  { %v1470_v63 = vmul.f32 -1.442695, %v1323_v36  ;;  %v1472_v1 = vmul.f32 -1.442695, %v1325_v37  ;;  %v1324_v40 = vadd.f32 %v1316_v38, %v1806_v25  ;;  %v1326_v45 = vadd.f32 %v1318_v44, %v1810_v27 }
 0x87a   :  { %v1268_v41 = vpop.f32.mrf.mxu0  ;;  %v1309_v42 = vpop.f32.mrf.mxu1 }
 0x87b   :  { %1656 = vpow2.f32 %v1470_v63  ;;  %v1471_v43 = vmul.f32 -1.442695, %v1324_v40  ;;  %v1473_v47 = vmul.f32 -1.442695, %v1326_v45 }
 0x87c   :  { %1658 = vpow2.f32 %v1472_v1 }
 0x87d   :  { %1660 = vpow2.f32 %v1471_v43 }
 0x888   :  { %v1657_v46 = vpop.eup %1656 }
 0x889   :  { %v1659_v24 = vpop.eup %1658  ;;  %v1339_v50 = vadd.f32 1.0, %v1657_v46 }
 0x88a   :  { %v1661_v26 = vpop.eup %1660  ;;  %v1341_v48 = vadd.f32 1.0, %v1659_v24 }
 0x88b   :  { %v1340_v49 = vadd.f32 1.0, %v1661_v26 }
 0x88c   :  { %1662 = vrcp.f32 %v1341_v48 }
 0x88d   :  { %1664 = vpow2.f32 %v1473_v47 }
 0x88e   :  { %1666 = vrcp.f32 %v1340_v49 }
 0x88f   :  { %1668 = vrcp.f32 %v1339_v50 }
 0x899   :  { %v1663_v25 = vpop.eup %1662 }
 0x89a   :  { %v1665_v51 = vpop.eup %1664  ;;  %v1351_v52 = vmul.f32 2.0, %v1663_v25 }
 0x89b   :  { %v1667_v53 = vpop.eup %1666  ;;  %v1342_v57 = vadd.f32 1.0, %v1665_v51 }
 0x89c   :  { %v1474_v54 = vadd.f32 -1.0, %v1351_v52  ;;  %v1669_v56 = vpop.eup %1668  ;;  %v1356_v58 = vmul.f32 %v1667_v53, %v1354_v55 }
 0x89d   :  { %1670 = vrcp.f32 %v1342_v57 }
 0x89e   :  { %v1357_v27 = vmul.f32 %v1669_v56, %v1474_v54 }
 0x8a0   :  { %v1358_v59 = vadd.f32 %v1357_v27, %v1356_v58 }
 0x8a2   :  { %1672 = vtanh.f32 %v1358_v59 }
 0x8aa   :  { %v1671_v3 = vpop.eup %1670 }
 0x8af   :  { %v1673_v28 = vpop.eup %1672 }
 0x8b0   :  { %v1360_v29 = vmul.f32 %v1673_v28, %v1671_v3 }
 0x8b2   :  { %v1368_v6 = vmul.f32 %v1475_v4, %v1360_v29 }
 0x8b4   :  { %v1370_v7 = vsel %vm1369_vm0, %v1368_v6, 0.0 }
 0x8b5   :  { %1371 = vadd.xlane.f32.xlu0 %v1370_v7 }
 0x93e   :  { %v1372_v9 = vpop.xlane.xlu0 %1371 }
 0x93f   :  { %v1380_v10 = vadd.f32 %v1476_v8, %v1372_v9 }
 0x941   :  { %1382 = vst.msk [vmem:[#allocation5 - $0x7] sm:$0x80] %vm1381_vm1, %v1380_v10 }
 0x942   :  { %1737 = shalt.err (!%p1734_p9)
}
 0x943   :  { %1392 = dma.vmem_to_hbm [thread:$0]  %s1390_s8, 16, %s2216_s6, [#allocation6]  }
 0x944   :  { %1748 = dma.done.wait [#allocation6], 16  }
 0x945   :  { %1749 = vsyncadd [#allocation6], 4294967280 }
 0x946   :  { %1396 = vsyncpa [#allocation6], 1 }
 0x947   :  { %1397 = vsyncmov [#allocation3] }
 0x94a   :  { %s1398_s12 = vpop.sfrf %1397 }
 0x94b   :  { %p1477_p10 = scmp.ne.s32.totalorder %s1398_s12, 0 }
 0x94d   :  { %1402 = shalt.err (%p1477_p10)  }

</bundles_post_ra>
